<compile_context>
chip_gen: v7x
topology: tpu7x:2x2x1
jax: 0.10.0
libtpu: 0.0.40
codegen_flags: <defaults>
</compile_context>

<pallas_src>
import jax
import jax.numpy as jnp
import numpy as np
from jax.experimental import pallas as pl
from jax.experimental.pallas import tpu as pltpu

_LANE = 128
_SUBLANE = 8


def _round_up(x, m):
    return ((x + m - 1) // m) * m


def _pad_to(a, shape):
    return jnp.pad(a, [(0, s - d) for d, s in zip(a.shape, shape)])


# ----------------------------------------------------------------------------
# Fused kernel: stacked RNN (tanh) + fc1 + sigmoid, one invocation, no grid.
# ----------------------------------------------------------------------------
def _make_rnn_fc_kernel(num_layers, seq_len, has_h0):
    n = num_layers

    def kernel(*refs):
        if has_h0:
            x_ref, h0_ref, w_in_ref, w_hh_ref, b_ref, out_ref, hid_ref = refs
        else:
            x_ref, w_in_ref, w_hh_ref, b_ref, out_ref, hid_ref = refs
            h0_ref = None

        S, Bp, P = x_ref.shape                                # time-major, tile-padded

        layer_in = x_ref[...].astype(jnp.float32)             # (S, Bp, P)
        h_finals = []
        for l in range(n):
            w_ih = w_in_ref[l]                                 # (P, P)
            w_hh = w_hh_ref[l]                                 # (P, P)
            b = b_ref[l]                                       # (1, P) = b_ih + b_hh

            # Input projection hoisted out of the recurrence: one big MXU matmul
            # per layer over the whole sequence.
            gx = jnp.dot(layer_in.reshape(S * Bp, P), w_ih,
                         preferred_element_type=jnp.float32) + b
            gx = gx.reshape(S, Bp, P)

            if has_h0:
                h = h0_ref[l].astype(jnp.float32)              # (Bp, P)
            else:
                h = jnp.zeros((Bp, P), jnp.float32)            # PyTorch default hidden

            hs = []
            for t in range(seq_len):                           # static unroll over time
                h = jnp.tanh(gx[t] +
                             jnp.dot(h, w_hh, preferred_element_type=jnp.float32))
                hs.append(h)                                   # kept in vregs
            h_finals.append(h)
            layer_in = jnp.stack(hs, axis=0)                   # (S, Bp, P), no VMEM scratch

        # Final hidden written once, lane-dense.
        hid_ref[...] = jnp.stack(h_finals, axis=0).astype(hid_ref.dtype)

        # Fused fc1 + sigmoid over the whole (S*Bp, P) slab (single matmul).
        fc_w = w_in_ref[n]
        fc_b = b_ref[n]
        y = jnp.dot(layer_in.reshape(S * Bp, P), fc_w,
                    preferred_element_type=jnp.float32) + fc_b
        out_ref[...] = jax.nn.sigmoid(y).reshape(S, Bp, P).astype(out_ref.dtype)

    return kernel


# ----------------------------------------------------------------------------
# Public wrapper: batch-first x, PyTorch-like (out, hidden) return.
# ----------------------------------------------------------------------------
def simple_rnn_forward(x, layer_params, fc_w, fc_b, h0=None):
    """x: (B, S, input_size) f32.  layer_params: list of (W_ih^T, W_hh^T, b_ih, b_hh).
    Returns (out (B, S, input_size), hidden (num_layers, B, hidden_size))."""
    B, S, D_in = x.shape
    n = len(layer_params)
    H = layer_params[0][0].shape[1]
    O = fc_w.shape[1]

    # Pad feature axes to 128 lanes and batch to 8 sublanes (layout plumbing only).
    P = _round_up(max(D_in, H, O), _LANE)
    Bp = _round_up(B, _SUBLANE)

    # Time-major + padded input.
    x_tm = _pad_to(jnp.transpose(x, (1, 0, 2)).astype(jnp.float32), (S, Bp, P))

    # Stack per-layer params (and fc1) into a handful of refs -> few DMA descriptors.
    w_in = jnp.stack([_pad_to(p[0], (P, P)) for p in layer_params]
                     + [_pad_to(fc_w, (P, P))], axis=0)               # (n+1, P, P)
    w_hh = jnp.stack([_pad_to(p[1], (P, P)) for p in layer_params], axis=0)   # (n, P, P)
    bias = jnp.stack([_pad_to(p[2] + p[3], (1, P)) for p in layer_params]
                     + [_pad_to(fc_b, (1, P))], axis=0)               # (n+1, 1, P)

    has_h0 = h0 is not None
    inputs = [x_tm]
    if has_h0:
        inputs.append(_pad_to(h0.astype(jnp.float32), (n, Bp, P)))
    inputs += [w_in, w_hh, bias]

    vmem = lambda: pl.BlockSpec(memory_space=pltpu.MemorySpace.VMEM)

    out_pad, hid_pad = pl.pallas_call(
        _make_rnn_fc_kernel(n, S, has_h0),
        out_shape=(jax.ShapeDtypeStruct((S, Bp, P), jnp.float32),
                   jax.ShapeDtypeStruct((n, Bp, P), jnp.float32)),
        in_specs=[vmem() for _ in inputs],
        out_specs=(vmem(), vmem()),
    )(*inputs)

    out = jnp.transpose(out_pad[:, :B, :O], (1, 0, 2))                # (B, S, O)
    hidden = hid_pad[:, :B, :H]                                       # (n, B, H)
    return out, hidden


# ----------------------------------------------------------------------------
# Deterministic parameter init (PyTorch-style uniform(-1/sqrt(H), 1/sqrt(H))).
# Weights stored pre-transposed as (in_dim, H) so kernels do x @ W.
# ----------------------------------------------------------------------------
def init_params(key, input_size, hidden_size, num_layers):
    k = 1.0 / np.sqrt(hidden_size)
    layer_params = []
    for layer in range(num_layers):
        d_in = input_size if layer == 0 else hidden_size
        keys = jax.random.split(jax.random.fold_in(key, layer), 4)
        uni = lambda kk, shape: jax.random.uniform(kk, shape, jnp.float32, -k, k)
        layer_params.append((
            uni(keys[0], (d_in, hidden_size)),         # W_ih^T
            uni(keys[1], (hidden_size, hidden_size)),  # W_hh^T
            uni(keys[2], (1, hidden_size)),            # b_ih
            uni(keys[3], (1, hidden_size)),            # b_hh
        ))

    fck = jax.random.split(jax.random.fold_in(key, 1000), 2)
    fc_w = jax.random.uniform(fck[0], (hidden_size, input_size), jnp.float32, -k, k)
    fc_b = jax.random.uniform(fck[1], (1, input_size), jnp.float32, -k, k)
    return layer_params, fc_w, fc_b


# ----------------------------------------------------------------------------
# Pure-JAX reference (same math as torch.nn.RNN(tanh) + Linear + Sigmoid).
# ----------------------------------------------------------------------------
def reference_forward(x, layer_params, fc_w, fc_b, h0=None):
    B, S, _ = x.shape
    layer_in = x
    h_finals = []
    for l, (w_ih, w_hh, b_ih, b_hh) in enumerate(layer_params):
        H = w_ih.shape[1]
        h = jnp.zeros((B, H), jnp.float32) if h0 is None else h0[l]
        outs = []
        for t in range(S):
            h = jnp.tanh(layer_in[:, t] @ w_ih + b_ih + h @ w_hh + b_hh)
            outs.append(h)
        layer_in = jnp.stack(outs, axis=1)
        h_finals.append(h)
    out = jax.nn.sigmoid(layer_in @ fc_w + fc_b)
    return out, jnp.stack(h_finals, axis=0)


if __name__ == "__main__":
    batch, seq, input_size, hidden_size, num_layers = 2, 8, 4, 32, 2

    key = jax.random.PRNGKey(0)
    kx, kp, kh = jax.random.split(key, 3)
    x = jax.random.normal(kx, (batch, seq, input_size), jnp.float32)
    layer_params, fc_w, fc_b = init_params(kp, input_size, hidden_size, num_layers)

    # Default path (hidden=None -> zero initial state), as in the PyTorch forward.
    fwd = jax.jit(lambda xx: simple_rnn_forward(xx, layer_params, fc_w, fc_b))
    out, hidden = fwd(x)
    jax.block_until_ready((out, hidden))

    ref_out, ref_hidden = reference_forward(x, layer_params, fc_w, fc_b)
    np.testing.assert_allclose(np.asarray(out), np.asarray(ref_out), rtol=1e-5, atol=1e-5)
    np.testing.assert_allclose(np.asarray(hidden), np.asarray(ref_hidden), rtol=1e-5, atol=1e-5)
    assert out.shape == (batch, seq, input_size)
    assert hidden.shape == (num_layers, batch, hidden_size)

    # Explicit initial-hidden path.
    h0 = 0.1 * jax.random.normal(kh, (num_layers, batch, hidden_size), jnp.float32)
    fwd_h = jax.jit(lambda xx, hh: simple_rnn_forward(xx, layer_params, fc_w, fc_b, hh))
    out2, hidden2 = fwd_h(x, h0)
    jax.block_until_ready((out2, hidden2))
    ref_out2, ref_hidden2 = reference_forward(x, layer_params, fc_w, fc_b, h0)
    np.testing.assert_allclose(np.asarray(out2), np.asarray(ref_out2), rtol=1e-5, atol=1e-5)
    np.testing.assert_allclose(np.asarray(hidden2), np.asarray(ref_hidden2), rtol=1e-5, atol=1e-5)

    print("KERNEL_OK")
</pallas_src>

<mosaic_0001>
module attributes {stable_mosaic.version = 11 : i64} {
  func.func @kernel(%arg0: memref<8x8x128xf32, #tpu.memory_space<vmem>>, %arg1: memref<3x128x128xf32, #tpu.memory_space<vmem>>, %arg2: memref<2x128x128xf32, #tpu.memory_space<vmem>>, %arg3: memref<3x1x128xf32, #tpu.memory_space<vmem>>, %arg4: memref<8x8x128xf32, #tpu.memory_space<vmem>>, %arg5: memref<2x8x128xf32, #tpu.memory_space<vmem>>) attributes {dimension_semantics = [], scalar_prefetch = 0 : i64, scratch_operands = 0 : i64, tpu.core_type = #tpu.core_type<tc>} {
    %c0 = arith.constant 0 : index
    %c0_0 = arith.constant 0 : index
    %c0_1 = arith.constant 0 : index
    %0 = vector.load %arg0[%c0, %c0_0, %c0_1] : memref<8x8x128xf32, #tpu.memory_space<vmem>>, vector<8x8x128xf32>
    %c0_2 = arith.constant 0 : index
    %c0_3 = arith.constant 0 : index
    %c0_4 = arith.constant 0 : index
    %1 = vector.load %arg1[%c0_2, %c0_3, %c0_4] : memref<3x128x128xf32, #tpu.memory_space<vmem>>, vector<1x128x128xf32>
    %2 = vector.shape_cast %1 : vector<1x128x128xf32> to vector<128x128xf32>
    %c0_5 = arith.constant 0 : index
    %c0_6 = arith.constant 0 : index
    %c0_7 = arith.constant 0 : index
    %3 = vector.load %arg2[%c0_5, %c0_6, %c0_7] : memref<2x128x128xf32, #tpu.memory_space<vmem>>, vector<1x128x128xf32>
    %4 = vector.shape_cast %3 : vector<1x128x128xf32> to vector<128x128xf32>
    %c0_8 = arith.constant 0 : index
    %c0_9 = arith.constant 0 : index
    %c0_10 = arith.constant 0 : index
    %5 = vector.load %arg3[%c0_8, %c0_9, %c0_10] : memref<3x1x128xf32, #tpu.memory_space<vmem>>, vector<1x1x128xf32>
    %6 = vector.shape_cast %5 : vector<1x1x128xf32> to vector<1x128xf32>
    %7 = vector.shape_cast %0 : vector<8x8x128xf32> to vector<64x128xf32>
    %cst = arith.constant dense<0.000000e+00> : vector<64x128xf32>
    %8 = tpu.matmul %7, %2, %cst {dimension_numbers = #tpu.dot_dimension_numbers<[1], [0], [0], [1], [0, 0, 1, 1], [], []>} : vector<64x128xf32>, vector<128x128xf32>, vector<64x128xf32> -> vector<64x128xf32>
    %9 = vector.broadcast %6 : vector<1x128xf32> to vector<64x128xf32>
    %10 = arith.addf %8, %9 : vector<64x128xf32>
    %11 = vector.shape_cast %10 : vector<64x128xf32> to vector<8x8x128xf32>
    %cst_11 = arith.constant 0.000000e+00 : f32
    %12 = vector.broadcast %cst_11 : f32 to vector<8x128xf32>
    %13 = vector.extract_strided_slice %11 {offsets = [0, 0, 0], sizes = [1, 8, 128], strides = [1, 1, 1]} : vector<8x8x128xf32> to vector<1x8x128xf32>
    %14 = vector.shape_cast %13 : vector<1x8x128xf32> to vector<8x128xf32>
    %cst_12 = arith.constant dense<0.000000e+00> : vector<8x128xf32>
    %15 = tpu.matmul %12, %4, %cst_12 {dimension_numbers = #tpu.dot_dimension_numbers<[1], [0], [0], [1], [0, 0, 1, 1], [], []>} : vector<8x128xf32>, vector<128x128xf32>, vector<8x128xf32> -> vector<8x128xf32>
    %16 = arith.addf %14, %15 : vector<8x128xf32>
    %17 = math.tanh %16 : vector<8x128xf32>
    %18 = vector.extract_strided_slice %11 {offsets = [1, 0, 0], sizes = [1, 8, 128], strides = [1, 1, 1]} : vector<8x8x128xf32> to vector<1x8x128xf32>
    %19 = vector.shape_cast %18 : vector<1x8x128xf32> to vector<8x128xf32>
    %cst_13 = arith.constant dense<0.000000e+00> : vector<8x128xf32>
    %20 = tpu.matmul %17, %4, %cst_13 {dimension_numbers = #tpu.dot_dimension_numbers<[1], [0], [0], [1], [0, 0, 1, 1], [], []>} : vector<8x128xf32>, vector<128x128xf32>, vector<8x128xf32> -> vector<8x128xf32>
    %21 = arith.addf %19, %20 : vector<8x128xf32>
    %22 = math.tanh %21 : vector<8x128xf32>
    %23 = vector.extract_strided_slice %11 {offsets = [2, 0, 0], sizes = [1, 8, 128], strides = [1, 1, 1]} : vector<8x8x128xf32> to vector<1x8x128xf32>
    %24 = vector.shape_cast %23 : vector<1x8x128xf32> to vector<8x128xf32>
    %cst_14 = arith.constant dense<0.000000e+00> : vector<8x128xf32>
    %25 = tpu.matmul %22, %4, %cst_14 {dimension_numbers = #tpu.dot_dimension_numbers<[1], [0], [0], [1], [0, 0, 1, 1], [], []>} : vector<8x128xf32>, vector<128x128xf32>, vector<8x128xf32> -> vector<8x128xf32>
    %26 = arith.addf %24, %25 : vector<8x128xf32>
    %27 = math.tanh %26 : vector<8x128xf32>
    %28 = vector.extract_strided_slice %11 {offsets = [3, 0, 0], sizes = [1, 8, 128], strides = [1, 1, 1]} : vector<8x8x128xf32> to vector<1x8x128xf32>
    %29 = vector.shape_cast %28 : vector<1x8x128xf32> to vector<8x128xf32>
    %cst_15 = arith.constant dense<0.000000e+00> : vector<8x128xf32>
    %30 = tpu.matmul %27, %4, %cst_15 {dimension_numbers = #tpu.dot_dimension_numbers<[1], [0], [0], [1], [0, 0, 1, 1], [], []>} : vector<8x128xf32>, vector<128x128xf32>, vector<8x128xf32> -> vector<8x128xf32>
    %31 = arith.addf %29, %30 : vector<8x128xf32>
    %32 = math.tanh %31 : vector<8x128xf32>
    %33 = vector.extract_strided_slice %11 {offsets = [4, 0, 0], sizes = [1, 8, 128], strides = [1, 1, 1]} : vector<8x8x128xf32> to vector<1x8x128xf32>
    %34 = vector.shape_cast %33 : vector<1x8x128xf32> to vector<8x128xf32>
    %cst_16 = arith.constant dense<0.000000e+00> : vector<8x128xf32>
    %35 = tpu.matmul %32, %4, %cst_16 {dimension_numbers = #tpu.dot_dimension_numbers<[1], [0], [0], [1], [0, 0, 1, 1], [], []>} : vector<8x128xf32>, vector<128x128xf32>, vector<8x128xf32> -> vector<8x128xf32>
    %36 = arith.addf %34, %35 : vector<8x128xf32>
    %37 = math.tanh %36 : vector<8x128xf32>
    %38 = vector.extract_strided_slice %11 {offsets = [5, 0, 0], sizes = [1, 8, 128], strides = [1, 1, 1]} : vector<8x8x128xf32> to vector<1x8x128xf32>
    %39 = vector.shape_cast %38 : vector<1x8x128xf32> to vector<8x128xf32>
    %cst_17 = arith.constant dense<0.000000e+00> : vector<8x128xf32>
    %40 = tpu.matmul %37, %4, %cst_17 {dimension_numbers = #tpu.dot_dimension_numbers<[1], [0], [0], [1], [0, 0, 1, 1], [], []>} : vector<8x128xf32>, vector<128x128xf32>, vector<8x128xf32> -> vector<8x128xf32>
    %41 = arith.addf %39, %40 : vector<8x128xf32>
    %42 = math.tanh %41 : vector<8x128xf32>
    %43 = vector.extract_strided_slice %11 {offsets = [6, 0, 0], sizes = [1, 8, 128], strides = [1, 1, 1]} : vector<8x8x128xf32> to vector<1x8x128xf32>
    %44 = vector.shape_cast %43 : vector<1x8x128xf32> to vector<8x128xf32>
    %cst_18 = arith.constant dense<0.000000e+00> : vector<8x128xf32>
    %45 = tpu.matmul %42, %4, %cst_18 {dimension_numbers = #tpu.dot_dimension_numbers<[1], [0], [0], [1], [0, 0, 1, 1], [], []>} : vector<8x128xf32>, vector<128x128xf32>, vector<8x128xf32> -> vector<8x128xf32>
    %46 = arith.addf %44, %45 : vector<8x128xf32>
    %47 = math.tanh %46 : vector<8x128xf32>
    %48 = vector.extract_strided_slice %11 {offsets = [7, 0, 0], sizes = [1, 8, 128], strides = [1, 1, 1]} : vector<8x8x128xf32> to vector<1x8x128xf32>
    %49 = vector.shape_cast %48 : vector<1x8x128xf32> to vector<8x128xf32>
    %cst_19 = arith.constant dense<0.000000e+00> : vector<8x128xf32>
    %50 = tpu.matmul %47, %4, %cst_19 {dimension_numbers = #tpu.dot_dimension_numbers<[1], [0], [0], [1], [0, 0, 1, 1], [], []>} : vector<8x128xf32>, vector<128x128xf32>, vector<8x128xf32> -> vector<8x128xf32>
    %51 = arith.addf %49, %50 : vector<8x128xf32>
    %52 = math.tanh %51 : vector<8x128xf32>
    %53 = vector.shape_cast %17 : vector<8x128xf32> to vector<1x8x128xf32>
    %54 = vector.shape_cast %22 : vector<8x128xf32> to vector<1x8x128xf32>
    %55 = vector.shape_cast %27 : vector<8x128xf32> to vector<1x8x128xf32>
    %56 = vector.shape_cast %32 : vector<8x128xf32> to vector<1x8x128xf32>
    %57 = vector.shape_cast %37 : vector<8x128xf32> to vector<1x8x128xf32>
    %58 = vector.shape_cast %42 : vector<8x128xf32> to vector<1x8x128xf32>
    %59 = vector.shape_cast %47 : vector<8x128xf32> to vector<1x8x128xf32>
    %60 = vector.shape_cast %52 : vector<8x128xf32> to vector<1x8x128xf32>
    %61 = tpu.concatenate %53, %54, %55, %56, %57, %58, %59, %60 in 0 : vector<1x8x128xf32>, vector<1x8x128xf32>, vector<1x8x128xf32>, vector<1x8x128xf32>, vector<1x8x128xf32>, vector<1x8x128xf32>, vector<1x8x128xf32>, vector<1x8x128xf32> -> vector<8x8x128xf32>
    %c1 = arith.constant 1 : index
    %c0_20 = arith.constant 0 : index
    %c0_21 = arith.constant 0 : index
    %62 = vector.load %arg1[%c1, %c0_20, %c0_21] : memref<3x128x128xf32, #tpu.memory_space<vmem>>, vector<1x128x128xf32>
    %63 = vector.shape_cast %62 : vector<1x128x128xf32> to vector<128x128xf32>
    %c1_22 = arith.constant 1 : index
    %c0_23 = arith.constant 0 : index
    %c0_24 = arith.constant 0 : index
    %64 = vector.load %arg2[%c1_22, %c0_23, %c0_24] : memref<2x128x128xf32, #tpu.memory_space<vmem>>, vector<1x128x128xf32>
    %65 = vector.shape_cast %64 : vector<1x128x128xf32> to vector<128x128xf32>
    %c1_25 = arith.constant 1 : index
    %c0_26 = arith.constant 0 : index
    %c0_27 = arith.constant 0 : index
    %66 = vector.load %arg3[%c1_25, %c0_26, %c0_27] : memref<3x1x128xf32, #tpu.memory_space<vmem>>, vector<1x1x128xf32>
    %67 = vector.shape_cast %66 : vector<1x1x128xf32> to vector<1x128xf32>
    %68 = vector.shape_cast %61 : vector<8x8x128xf32> to vector<64x128xf32>
    %cst_28 = arith.constant dense<0.000000e+00> : vector<64x128xf32>
    %69 = tpu.matmul %68, %63, %cst_28 {dimension_numbers = #tpu.dot_dimension_numbers<[1], [0], [0], [1], [0, 0, 1, 1], [], []>} : vector<64x128xf32>, vector<128x128xf32>, vector<64x128xf32> -> vector<64x128xf32>
    %70 = vector.broadcast %67 : vector<1x128xf32> to vector<64x128xf32>
    %71 = arith.addf %69, %70 : vector<64x128xf32>
    %72 = vector.shape_cast %71 : vector<64x128xf32> to vector<8x8x128xf32>
    %cst_29 = arith.constant 0.000000e+00 : f32
    %73 = vector.broadcast %cst_29 : f32 to vector<8x128xf32>
    %74 = vector.extract_strided_slice %72 {offsets = [0, 0, 0], sizes = [1, 8, 128], strides = [1, 1, 1]} : vector<8x8x128xf32> to vector<1x8x128xf32>
    %75 = vector.shape_cast %74 : vector<1x8x128xf32> to vector<8x128xf32>
    %cst_30 = arith.constant dense<0.000000e+00> : vector<8x128xf32>
    %76 = tpu.matmul %73, %65, %cst_30 {dimension_numbers = #tpu.dot_dimension_numbers<[1], [0], [0], [1], [0, 0, 1, 1], [], []>} : vector<8x128xf32>, vector<128x128xf32>, vector<8x128xf32> -> vector<8x128xf32>
    %77 = arith.addf %75, %76 : vector<8x128xf32>
    %78 = math.tanh %77 : vector<8x128xf32>
    %79 = vector.extract_strided_slice %72 {offsets = [1, 0, 0], sizes = [1, 8, 128], strides = [1, 1, 1]} : vector<8x8x128xf32> to vector<1x8x128xf32>
    %80 = vector.shape_cast %79 : vector<1x8x128xf32> to vector<8x128xf32>
    %cst_31 = arith.constant dense<0.000000e+00> : vector<8x128xf32>
    %81 = tpu.matmul %78, %65, %cst_31 {dimension_numbers = #tpu.dot_dimension_numbers<[1], [0], [0], [1], [0, 0, 1, 1], [], []>} : vector<8x128xf32>, vector<128x128xf32>, vector<8x128xf32> -> vector<8x128xf32>
    %82 = arith.addf %80, %81 : vector<8x128xf32>
    %83 = math.tanh %82 : vector<8x128xf32>
    %84 = vector.extract_strided_slice %72 {offsets = [2, 0, 0], sizes = [1, 8, 128], strides = [1, 1, 1]} : vector<8x8x128xf32> to vector<1x8x128xf32>
    %85 = vector.shape_cast %84 : vector<1x8x128xf32> to vector<8x128xf32>
    %cst_32 = arith.constant dense<0.000000e+00> : vector<8x128xf32>
    %86 = tpu.matmul %83, %65, %cst_32 {dimension_numbers = #tpu.dot_dimension_numbers<[1], [0], [0], [1], [0, 0, 1, 1], [], []>} : vector<8x128xf32>, vector<128x128xf32>, vector<8x128xf32> -> vector<8x128xf32>
    %87 = arith.addf %85, %86 : vector<8x128xf32>
    %88 = math.tanh %87 : vector<8x128xf32>
    %89 = vector.extract_strided_slice %72 {offsets = [3, 0, 0], sizes = [1, 8, 128], strides = [1, 1, 1]} : vector<8x8x128xf32> to vector<1x8x128xf32>
    %90 = vector.shape_cast %89 : vector<1x8x128xf32> to vector<8x128xf32>
    %cst_33 = arith.constant dense<0.000000e+00> : vector<8x128xf32>
    %91 = tpu.matmul %88, %65, %cst_33 {dimension_numbers = #tpu.dot_dimension_numbers<[1], [0], [0], [1], [0, 0, 1, 1], [], []>} : vector<8x128xf32>, vector<128x128xf32>, vector<8x128xf32> -> vector<8x128xf32>
    %92 = arith.addf %90, %91 : vector<8x128xf32>
    %93 = math.tanh %92 : vector<8x128xf32>
    %94 = vector.extract_strided_slice %72 {offsets = [4, 0, 0], sizes = [1, 8, 128], strides = [1, 1, 1]} : vector<8x8x128xf32> to vector<1x8x128xf32>
    %95 = vector.shape_cast %94 : vector<1x8x128xf32> to vector<8x128xf32>
    %cst_34 = arith.constant dense<0.000000e+00> : vector<8x128xf32>
    %96 = tpu.matmul %93, %65, %cst_34 {dimension_numbers = #tpu.dot_dimension_numbers<[1], [0], [0], [1], [0, 0, 1, 1], [], []>} : vector<8x128xf32>, vector<128x128xf32>, vector<8x128xf32> -> vector<8x128xf32>
    %97 = arith.addf %95, %96 : vector<8x128xf32>
    %98 = math.tanh %97 : vector<8x128xf32>
    %99 = vector.extract_strided_slice %72 {offsets = [5, 0, 0], sizes = [1, 8, 128], strides = [1, 1, 1]} : vector<8x8x128xf32> to vector<1x8x128xf32>
    %100 = vector.shape_cast %99 : vector<1x8x128xf32> to vector<8x128xf32>
    %cst_35 = arith.constant dense<0.000000e+00> : vector<8x128xf32>
    %101 = tpu.matmul %98, %65, %cst_35 {dimension_numbers = #tpu.dot_dimension_numbers<[1], [0], [0], [1], [0, 0, 1, 1], [], []>} : vector<8x128xf32>, vector<128x128xf32>, vector<8x128xf32> -> vector<8x128xf32>
    %102 = arith.addf %100, %101 : vector<8x128xf32>
    %103 = math.tanh %102 : vector<8x128xf32>
    %104 = vector.extract_strided_slice %72 {offsets = [6, 0, 0], sizes = [1, 8, 128], strides = [1, 1, 1]} : vector<8x8x128xf32> to vector<1x8x128xf32>
    %105 = vector.shape_cast %104 : vector<1x8x128xf32> to vector<8x128xf32>
    %cst_36 = arith.constant dense<0.000000e+00> : vector<8x128xf32>
    %106 = tpu.matmul %103, %65, %cst_36 {dimension_numbers = #tpu.dot_dimension_numbers<[1], [0], [0], [1], [0, 0, 1, 1], [], []>} : vector<8x128xf32>, vector<128x128xf32>, vector<8x128xf32> -> vector<8x128xf32>
    %107 = arith.addf %105, %106 : vector<8x128xf32>
    %108 = math.tanh %107 : vector<8x128xf32>
    %109 = vector.extract_strided_slice %72 {offsets = [7, 0, 0], sizes = [1, 8, 128], strides = [1, 1, 1]} : vector<8x8x128xf32> to vector<1x8x128xf32>
    %110 = vector.shape_cast %109 : vector<1x8x128xf32> to vector<8x128xf32>
    %cst_37 = arith.constant dense<0.000000e+00> : vector<8x128xf32>
    %111 = tpu.matmul %108, %65, %cst_37 {dimension_numbers = #tpu.dot_dimension_numbers<[1], [0], [0], [1], [0, 0, 1, 1], [], []>} : vector<8x128xf32>, vector<128x128xf32>, vector<8x128xf32> -> vector<8x128xf32>
    %112 = arith.addf %110, %111 : vector<8x128xf32>
    %113 = math.tanh %112 : vector<8x128xf32>
    %114 = vector.shape_cast %78 : vector<8x128xf32> to vector<1x8x128xf32>
    %115 = vector.shape_cast %83 : vector<8x128xf32> to vector<1x8x128xf32>
    %116 = vector.shape_cast %88 : vector<8x128xf32> to vector<1x8x128xf32>
    %117 = vector.shape_cast %93 : vector<8x128xf32> to vector<1x8x128xf32>
    %118 = vector.shape_cast %98 : vector<8x128xf32> to vector<1x8x128xf32>
    %119 = vector.shape_cast %103 : vector<8x128xf32> to vector<1x8x128xf32>
    %120 = vector.shape_cast %108 : vector<8x128xf32> to vector<1x8x128xf32>
    %121 = vector.shape_cast %113 : vector<8x128xf32> to vector<1x8x128xf32>
    %122 = tpu.concatenate %114, %115, %116, %117, %118, %119, %120, %121 in 0 : vector<1x8x128xf32>, vector<1x8x128xf32>, vector<1x8x128xf32>, vector<1x8x128xf32>, vector<1x8x128xf32>, vector<1x8x128xf32>, vector<1x8x128xf32>, vector<1x8x128xf32> -> vector<8x8x128xf32>
    %123 = vector.shape_cast %52 : vector<8x128xf32> to vector<1x8x128xf32>
    %124 = vector.shape_cast %113 : vector<8x128xf32> to vector<1x8x128xf32>
    %125 = tpu.concatenate %123, %124 in 0 : vector<1x8x128xf32>, vector<1x8x128xf32> -> vector<2x8x128xf32>
    %c0_38 = arith.constant 0 : index
    %c0_39 = arith.constant 0 : index
    %c0_40 = arith.constant 0 : index
    %126 = vector.load %arg5[%c0_38, %c0_39, %c0_40] : memref<2x8x128xf32, #tpu.memory_space<vmem>>, vector<2x8x128xf32>
    tpu.vector_store %arg5[%c0_38, %c0_39, %c0_40], %125 {strides = array<i32>} : memref<2x8x128xf32, #tpu.memory_space<vmem>>, vector<2x8x128xf32>,
    %c2 = arith.constant 2 : index
    %c0_41 = arith.constant 0 : index
    %c0_42 = arith.constant 0 : index
    %127 = vector.load %arg1[%c2, %c0_41, %c0_42] : memref<3x128x128xf32, #tpu.memory_space<vmem>>, vector<1x128x128xf32>
    %128 = vector.shape_cast %127 : vector<1x128x128xf32> to vector<128x128xf32>
    %c2_43 = arith.constant 2 : index
    %c0_44 = arith.constant 0 : index
    %c0_45 = arith.constant 0 : index
    %129 = vector.load %arg3[%c2_43, %c0_44, %c0_45] : memref<3x1x128xf32, #tpu.memory_space<vmem>>, vector<1x1x128xf32>
    %130 = vector.shape_cast %129 : vector<1x1x128xf32> to vector<1x128xf32>
    %131 = vector.shape_cast %122 : vector<8x8x128xf32> to vector<64x128xf32>
    %cst_46 = arith.constant dense<0.000000e+00> : vector<64x128xf32>
    %132 = tpu.matmul %131, %128, %cst_46 {dimension_numbers = #tpu.dot_dimension_numbers<[1], [0], [0], [1], [0, 0, 1, 1], [], []>} : vector<64x128xf32>, vector<128x128xf32>, vector<64x128xf32> -> vector<64x128xf32>
    %133 = vector.broadcast %130 : vector<1x128xf32> to vector<64x128xf32>
    %134 = arith.addf %132, %133 : vector<64x128xf32>
    %135 = arith.negf %134 : vector<64x128xf32>
    %136 = math.exp %135 : vector<64x128xf32>
    %cst_47 = arith.constant 1.000000e+00 : f32
    %137 = vector.broadcast %cst_47 : f32 to vector<64x128xf32>
    %138 = arith.addf %137, %136 : vector<64x128xf32>
    %139 = arith.divf %137, %138 : vector<64x128xf32>
    %140 = vector.shape_cast %139 : vector<64x128xf32> to vector<8x8x128xf32>
    %c0_48 = arith.constant 0 : index
    %c0_49 = arith.constant 0 : index
    %c0_50 = arith.constant 0 : index
    %141 = vector.load %arg4[%c0_48, %c0_49, %c0_50] : memref<8x8x128xf32, #tpu.memory_space<vmem>>, vector<8x8x128xf32>
    tpu.vector_store %arg4[%c0_48, %c0_49, %c0_50], %140 {strides = array<i32>} : memref<8x8x128xf32, #tpu.memory_space<vmem>>, vector<8x8x128xf32>,
    return
  }
}

</mosaic_0001>

<bundles_post_ra>
// kernel: _lambda_.1
= control target key start
LH: loop header
LB: loop body
LE: loop exit
PB: predicated region body
PF: predicated region fallthrough
CT: control target
= control target key end

     0   :  { %11 = vsyncpa [#allocation3], 0  ;;  %s3886_s0 = inlined_call_operand.vmem [shape: f32[8,8,128], index: 0, kind: input, shape index: {}]   ;;  %s3887_s1 = inlined_call_operand.hbm [shape: f32[3,128,128], index: 1, kind: input, shape index: {}]   ;;  %s3888_s2 = inlined_call_operand.hbm [shape: f32[2,128,128], index: 2, kind: input, shape index: {}]   ;;  %s3889_s3 = inlined_call_operand.vmem [shape: f32[3,1,128], index: 3, kind: input, shape index: {}]   ;;  %s3890_s4 = inlined_call_operand.vmem [shape: f32[8,8,128], index: 4, kind: output, shape index: {0}]   ;;  %s3891_s5 = inlined_call_operand.vmem [shape: f32[2,8,128], index: 5, kind: output, shape index: {1}]  }
   0x1   :  { %12 = vsyncpa [#allocation5], 0  ;;  %s3344_s18 = smov [#allocation2]   ;;  %s3296_s22 = scalar_lea.hbm %s3887_s1, 6144 }
   0x2   :  { %s20_s19 = sshll.u32 %s3344_s18, 4  ;;  %p3297_p0 = scmp.ne.s32.totalorder %s3887_s1, %s3296_s22  ;;  %s21_s19 = int_to_ptr.vmem [resolvable:$true] %s20_s19 }
   0x3   :  { %p3300_p1 = scmp.lt.u32.totalorder %s3296_s22, %s3887_s1 }
   0x5   :  { %p3302_p2 = pnand %p3300_p1, %p3297_p0 }
   0x7   :  { %3305 = shalt.err (!%p3302_p2)
}
   0x8   :  { %s3306_s27 = scalar_lea.vmem %s21_s19, 6144  ;;  %p3311_p4 = scmp.lt.s32.totalorder %s21_s19, %s21_s19 }
   0x9   :  { %p3307_p3 = scmp.ne.s32.totalorder %s21_s19, %s3306_s27  ;;  %p3312_p5 = scmp.lt.s32.totalorder %s3306_s27, %s3306_s27 }
   0xb   :  { %p3313_p6 = por %p3312_p5, %p3311_p4 }
   0xd   :  { %p3314_p7 = pnand %p3313_p6, %p3307_p3 }
   0xf   :  { %3317 = shalt.err (!%p3314_p7)
}
  0x10   :  { %s3345_s28 = smov 128   ;;  %s3346_s29 = smov 8  }
  0x11   :  { %26 = dma.hbm_to_vmem [thread:$0]  %s3887_s1, 6144, %s21_s19, [#allocation3], %s3345_s28, %s3345_s28, %s3346_s29  }
  0x12   :  { %s3347_s7 = smov [#allocation4]   ;;  %s3318_s11 = scalar_lea.hbm %s3888_s2, 4096 }
  0x13   :  { %s32_s8 = sshll.u32 %s3347_s7, 4  ;;  %p3319_p8 = scmp.ne.s32.totalorder %s3888_s2, %s3318_s11  ;;  %s33_s8 = int_to_ptr.vmem [resolvable:$true] %s32_s8 }
  0x14   :  { %p3322_p9 = scmp.lt.u32.totalorder %s3318_s11, %s3888_s2 }
  0x16   :  { %p3324_p10 = pnand %p3322_p9, %p3319_p8 }
  0x18   :  { %3327 = shalt.err (!%p3324_p10)
}
  0x19   :  { %s3328_s16 = scalar_lea.vmem %s33_s8, 4096  ;;  %p3333_p12 = scmp.lt.s32.totalorder %s33_s8, %s33_s8 }
  0x1a   :  { %p3329_p11 = scmp.ne.s32.totalorder %s33_s8, %s3328_s16  ;;  %p3334_p13 = scmp.lt.s32.totalorder %s3328_s16, %s3328_s16 }
  0x1c   :  { %p3335_p0 = por %p3334_p13, %p3333_p12 }
  0x1e   :  { %p3336_p1 = pnand %p3335_p0, %p3329_p11 }
  0x20   :  { %3339 = shalt.err (!%p3336_p1)
}
  0x21   :  { %38 = dma.hbm_to_vmem [thread:$0]  %s3888_s2, 4096, %s33_s8, [#allocation5], %s3345_s28, %s3345_s28, %s3346_s29  }
  0x22   :  { %3340 = dma.done.wait [#allocation3], 6144  }
  0x23   :  { %3341 = vsyncadd [#allocation3], 4294961152 }
  0x24   :  { %3342 = dma.done.wait [#allocation5], 4096  }
  0x25   :  { %3343 = vsyncadd [#allocation5], 4294963200  ;;  %v3348_v0 = vmov 0.0|0.0   ;;  %vm3349_vm0 = vmmov 0   ;;  %v3350_v1 = vmov 0.0   ;;  %v55_v2 = vld [vmem:[#allocation2] sm:$0xff] }
  0x26   :  { %2801 = vmatprep.subr.bf16.mxu0 %v3348_v0  ;;  %2164 = vmatprep.mubr.msk.f32.mxu0 %vm3349_vm0, %v3350_v1  ;;  %v56_v3 = vld [vmem:[#allocation2 + $0x8] sm:$0xff]  ;;  %v57_v4 = vld [vmem:[#allocation2 + $0x10] sm:$0xff]  ;;  %v58_v6 = vld [vmem:[#allocation2 + $0x18] sm:$0xff] }
  0x27   :  { %v2745_v5 = vpack.c.bf16 %v56_v3, %v55_v2  ;;  %v2749_v7 = vpack.c.bf16 %v58_v6, %v57_v4  ;;  %v59_v8 = vld [vmem:[#allocation2 + $0x20] sm:$0xff]  ;;  %v60_v9 = vld [vmem:[#allocation2 + $0x28] sm:$0xff]  ;;  %v61_v11 = vld [vmem:[#allocation2 + $0x30] sm:$0xff] }
  0x28   :  { %v2753_v10 = vpack.c.bf16 %v60_v9, %v59_v8  ;;  %v47_v12 = vld [vmem:[%s3886_s0] sm:$0xff]  ;;  %v62_v13 = vld [vmem:[#allocation2 + $0x38] sm:$0xff]  ;;  %v72_v15 = vld [vmem:[#allocation4 + $0x8] sm:$0xff] }
  0x29   :  { %2746 = vmatprep.subr.bf16.mxu1 %v2745_v5  ;;  %2085 = vmatprep.mubr.f32.mxu1 %v47_v12  ;;  %v71_v14 = vld [vmem:[#allocation4] sm:$0xff]  ;;  %v73_v17 = vld [vmem:[#allocation4 + $0x10] sm:$0xff]  ;;  %v74_v18 = vld [vmem:[#allocation4 + $0x18] sm:$0xff]  ;;  %v2757_v19 = vpack.c.bf16 %v62_v13, %v61_v11 }
  0x2a   :  { %2748 = vmatpush3.bf16.msra.mxu1 %v2745_v5  ;;  %v3411_v16 = vpack.c.bf16 %v72_v15, %v71_v14  ;;  %v63_v20 = vld [vmem:[#allocation2 + $0x40] sm:$0xff]  ;;  %v64_v21 = vld [vmem:[#allocation2 + $0x48] sm:$0xff]  ;;  %v3415_v22 = vpack.c.bf16 %v74_v18, %v73_v17  ;;  %v65_v26 = vld [vmem:[#allocation2 + $0x50] sm:$0xff] }
  0x2b   :  { %2750 = vmatprep.subr.bf16.mxu1 %v2749_v7  ;;  %v75_v23 = vld [vmem:[#allocation4 + $0x20] sm:$0xff]  ;;  %v76_v24 = vld [vmem:[#allocation4 + $0x28] sm:$0xff]  ;;  %v2761_v25 = vpack.c.bf16 %v64_v21, %v63_v20  ;;  %v66_v27 = vld [vmem:[#allocation2 + $0x58] sm:$0xff] }
  0x2c   :  { %2803 = vmatpush3.bf16.msra.mxu0 %v3411_v16  ;;  %v3419_v28 = vpack.c.bf16 %v76_v24, %v75_v23  ;;  %v77_v29 = vld [vmem:[#allocation4 + $0x30] sm:$0xff]  ;;  %v78_v30 = vld [vmem:[#allocation4 + $0x38] sm:$0xff]  ;;  %v2765_v31 = vpack.c.bf16 %v66_v27, %v65_v26  ;;  %v67_v32 = vld [vmem:[#allocation2 + $0x60] sm:$0xff] }
  0x2d   :  { %2804 = vmatprep.subr.bf16.mxu0 %v3348_v0  ;;  %v68_v33 = vld [vmem:[#allocation2 + $0x68] sm:$0xff]  ;;  %v3423_v34 = vpack.c.bf16 %v78_v30, %v77_v29  ;;  %v79_v35 = vld [vmem:[#allocation4 + $0x40] sm:$0xff]  ;;  %v69_v38 = vld [vmem:[#allocation2 + $0x70] sm:$0xff] }
  0x2e   :  { %2752 = vmatpush3.bf16.msra.mxu1 %v2749_v7  ;;  %v80_v36 = vld [vmem:[#allocation4 + $0x48] sm:$0xff]  ;;  %v2769_v37 = vpack.c.bf16 %v68_v33, %v67_v32  ;;  %v70_v39 = vld [vmem:[#allocation2 + $0x78] sm:$0xff]  ;;  %v81_v41 = vld [vmem:[#allocation4 + $0x50] sm:$0xff] }
  0x2f   :  { %2754 = vmatprep.subr.bf16.mxu1 %v2753_v10  ;;  %v3427_v40 = vpack.c.bf16 %v80_v36, %v79_v35  ;;  %v82_v42 = vld [vmem:[#allocation4 + $0x58] sm:$0xff]  ;;  %v2773_v43 = vpack.c.bf16 %v70_v39, %v69_v38  ;;  %v83_v45 = vld [vmem:[#allocation4 + $0x60] sm:$0xff]  ;;  %v84_v46 = vld [vmem:[#allocation4 + $0x68] sm:$0xff] }
  0x30   :  { %2806 = vmatpush3.bf16.msra.mxu0 %v3415_v22  ;;  %v3431_v44 = vpack.c.bf16 %v82_v42, %v81_v41  ;;  %v3435_v47 = vpack.c.bf16 %v84_v46, %v83_v45  ;;  %v48_v48 = vld [vmem:[%s3886_s0 + $0x8] sm:$0xff]  ;;  %v85_v49 = vld [vmem:[#allocation4 + $0x70] sm:$0xff]  ;;  %v86_v50 = vld [vmem:[#allocation4 + $0x78] sm:$0xff] }
  0x31   :  { %2807 = vmatprep.subr.bf16.mxu0 %v3348_v0  ;;  %v49_v51 = vld [vmem:[%s3886_s0 + $0x10] sm:$0xff]  ;;  %v3446_v52 = vpack.c.bf16 %v86_v50, %v85_v49  ;;  %v50_v53 = vld [vmem:[%s3886_s0 + $0x18] sm:$0xff]  ;;  %v51_v54 = vld [vmem:[%s3886_s0 + $0x20] sm:$0xff] }
  0x32   :  { %2756 = vmatpush3.bf16.msra.mxu1 %v2753_v10  ;;  %v52_v55 = vld [vmem:[%s3886_s0 + $0x28] sm:$0xff]  ;;  %v53_v56 = vld [vmem:[%s3886_s0 + $0x30] sm:$0xff]  ;;  %v54_v57 = vld [vmem:[%s3886_s0 + $0x38] sm:$0xff] }
  0x33   :  { %2758 = vmatprep.subr.bf16.mxu1 %v2757_v19  ;;  %v1696_v58 = vld [vmem:[%s3889_s3] ss:$0 sm:$0xff]  ;;  %v778_v39 = vld [vmem:[#allocation2 + $0x90] sm:$0xff]  ;;  %v785_v50 = vld [vmem:[#allocation2 + $0xc8] sm:$0xff] }
  0x34   :  { %2809 = vmatpush3.bf16.msra.mxu0 %v3419_v28  ;;  %v782_v46 = vld [vmem:[#allocation2 + $0xb0] sm:$0xff]  ;;  %v784_v49 = vld [vmem:[#allocation2 + $0xc0] sm:$0xff] }
  0x35   :  { %2810 = vmatprep.subr.bf16.mxu0 %v3348_v0 }
  0x36   :  { %2760 = vmatpush3.bf16.msra.mxu1 %v2757_v19 }
  0x37   :  { %2762 = vmatprep.subr.bf16.mxu1 %v2761_v25 }
  0x38   :  { %2812 = vmatpush3.bf16.msra.mxu0 %v3423_v34 }
  0x39   :  { %2813 = vmatprep.subr.bf16.mxu0 %v3348_v0 }
  0x3a   :  { %2764 = vmatpush3.bf16.msra.mxu1 %v2761_v25 }
  0x3b   :  { %2766 = vmatprep.subr.bf16.mxu1 %v2765_v31 }
  0x3c   :  { %2815 = vmatpush3.bf16.msra.mxu0 %v3427_v40 }
  0x3d   :  { %2816 = vmatprep.subr.bf16.mxu0 %v3348_v0 }
  0x3e   :  { %2768 = vmatpush3.bf16.msra.mxu1 %v2765_v31 }
  0x3f   :  { %2770 = vmatprep.subr.bf16.mxu1 %v2769_v37 }
  0x40   :  { %2818 = vmatpush3.bf16.msra.mxu0 %v3431_v44 }
  0x41   :  { %2819 = vmatprep.subr.bf16.mxu0 %v3348_v0 }
  0x42   :  { %2772 = vmatpush3.bf16.msra.mxu1 %v2769_v37 }
  0x43   :  { %2774 = vmatprep.subr.bf16.mxu1 %v2773_v43 }
  0x44   :  { %2821 = vmatpush3.bf16.msra.mxu0 %v3435_v47 }
  0x45   :  { %2822 = vmatprep.subr.bf16.mxu0 %v3348_v0 }
  0x46   :  { %2776 = vmatpush3.bf16.msra.mxu1 %v2773_v43  ;;  %v780_v43 = vld [vmem:[#allocation2 + $0xa0] sm:$0xff] }
  0x47   :  { %2777 = vmatprep.subr.bf16.mxu1 %v3348_v0 }
  0x48   :  { %2824 = vmatpush3.bf16.msra.mxu0 %v3446_v52 }
  0x49   :  { %2086 = vmatmul.mubr.f32.vlgmr.msra.gmra.mrb[0].mxu1 %v48_v48  ;;  %2849 = vmatprep.subr.bf16.mxu0 %v3348_v0 }
  0x4a   :  { %2779 = vmatpush3.bf16.msra.mxu1 %v3411_v16  ;;  %2088 = vmatprep.mubr.f32.mxu1 %v49_v51  ;;  %v2985_v51 = vpack.c.bf16 %v785_v50, %v784_v49 }
  0x4b   :  { %2780 = vmatprep.subr.bf16.mxu1 %v3348_v0 }
  0x4d   :  { %2089 = vmatmul.mubr.f32.gmra.mrb[2].mxu1 %v50_v53  ;;  %v787_v53 = vld [vmem:[#allocation2 + $0xd8] sm:$0xff] }
  0x4e   :  { %2782 = vmatpush3.bf16.msra.mxu1 %v3415_v22  ;;  %2091 = vmatprep.mubr.f32.mxu1 %v51_v54 }
  0x4f   :  { %2783 = vmatprep.subr.bf16.mxu1 %v3348_v0 }
  0x51   :  { %2092 = vmatmul.mubr.f32.gmra.mrb[4].mxu1 %v52_v55  ;;  %v788_v55 = vld [vmem:[#allocation2 + $0xe0] sm:$0xff] }
  0x52   :  { %2785 = vmatpush3.bf16.msra.mxu1 %v3419_v28  ;;  %2094 = vmatprep.mubr.f32.mxu1 %v53_v56  ;;  %v789_v56 = vld [vmem:[#allocation2 + $0xe8] sm:$0xff] }
  0x53   :  { %2786 = vmatprep.subr.bf16.mxu1 %v3348_v0 }
  0x55   :  { %2095 = vmatmul.mubr.f32.gmra.mrb[6].mxu1 %v54_v57  ;;  %v2993_v57 = vpack.c.bf16 %v789_v56, %v788_v55 }
  0x56   :  { %2788 = vmatpush3.bf16.msra.mxu1 %v3423_v34  ;;  %2129 = vmatprep.mubr.msk.f32.mxu1 %vm3349_vm0, %v3350_v1 }
  0x57   :  { %2789 = vmatprep.subr.bf16.mxu1 %v3348_v0 }
  0x5a   :  { %2791 = vmatpush3.bf16.msra.mxu1 %v3427_v40 }
  0x5b   :  { %2792 = vmatprep.subr.bf16.mxu1 %v3348_v0 }
  0x5e   :  { %2794 = vmatpush3.bf16.msra.mxu1 %v3431_v44 }
  0x5f   :  { %2795 = vmatprep.subr.bf16.mxu1 %v3348_v0 }
  0x62   :  { %2797 = vmatpush3.bf16.msra.mxu1 %v3435_v47 }
  0x63   :  { %2798 = vmatprep.subr.bf16.mxu1 %v3348_v0 }
  0x66   :  { %2800 = vmatpush3.bf16.msra.mxu1 %v3446_v52 }
  0x67   :  { %2825 = vmatprep.subr.bf16.mxu1 %v3348_v0 }
  0x69   :  { %2130 = vmatmul.mubr.f32.vlgmr.msra.gmra.mrb[8].mxu1 %v3350_v1 }
  0x6a   :  { %2827 = vmatpush3.bf16.msra.mxu1 %v3411_v16  ;;  %2199 = vmatprep.mubr.msk.f32.mxu1 %vm3349_vm0, %v3350_v1 }
  0x6b   :  { %2828 = vmatprep.subr.bf16.mxu1 %v3348_v0 }
  0x6e   :  { %2830 = vmatpush3.bf16.msra.mxu1 %v3415_v22 }
  0x6f   :  { %2831 = vmatprep.subr.bf16.mxu1 %v3348_v0 }
  0x72   :  { %2833 = vmatpush3.bf16.msra.mxu1 %v3419_v28 }
  0x73   :  { %2834 = vmatprep.subr.bf16.mxu1 %v3348_v0 }
  0x76   :  { %2836 = vmatpush3.bf16.msra.mxu1 %v3423_v34 }
  0x77   :  { %2837 = vmatprep.subr.bf16.mxu1 %v3348_v0 }
  0x7a   :  { %2839 = vmatpush3.bf16.msra.mxu1 %v3427_v40 }
  0x7b   :  { %2840 = vmatprep.subr.bf16.mxu1 %v3348_v0 }
  0x7e   :  { %2842 = vmatpush3.bf16.msra.mxu1 %v3431_v44 }
  0x7f   :  { %2843 = vmatprep.subr.bf16.mxu1 %v3348_v0 }
  0x82   :  { %2845 = vmatpush3.bf16.msra.mxu1 %v3435_v47 }
  0x83   :  { %2846 = vmatprep.subr.bf16.mxu1 %v3348_v0 }
  0x86   :  { %2848 = vmatpush3.bf16.msra.mxu1 %v3446_v52 }
  0x87   :  { %2873 = vmatprep.subr.bf16.mxu1 %v3348_v0 }
 0x11c   :  { %v2087_v59 = vpop.f32.mrb[0].mxu1 }
 0x11d   :  { %v166_v60 = vadd.f32 %v2087_v59, %v1696_v58  ;;  %v160_v61 = vpop.f32.mrb[1].mxu1  ;;  %v791_v59 = vld [vmem:[#allocation2 + $0xf8] sm:$0xff] }
 0x11e   :  { %v161_v12 = vadd.f32 %v1696_v58, %v160_v61  ;;  %v793_v61 = vld [vmem:[#allocation4 + $0x80] sm:$0xff] }
 0x120   :  { %v2090_v62 = vpop.f32.mrb[2].mxu1 }
 0x121   :  { %v3505_v63 = vadd.f32 %v2090_v62, %v1696_v58  ;;  %v170_v2 = vpop.f32.mrb[3].mxu1  ;;  %v794_v62 = vld [vmem:[#allocation4 + $0x88] sm:$0xff] }
 0x122   :  { %v171_v3 = vadd.f32 %v1696_v58, %v170_v2  ;;  %v795_v2 = vld [vmem:[#allocation4 + $0x90] sm:$0xff] }
 0x124   :  { %v2093_v4 = vpop.f32.mrb[4].mxu1 }
 0x125   :  { %v3507_v5 = vadd.f32 %v2093_v4, %v1696_v58  ;;  %v180_v6 = vpop.f32.mrb[5].mxu1 }
 0x126   :  { %v3509_v7 = vadd.f32 %v1696_v58, %v180_v6  ;;  %v798_v6 = vld [vmem:[#allocation4 + $0xa8] sm:$0xff] }
 0x128   :  { %v2096_v8 = vpop.f32.mrb[6].mxu1 }
 0x129   :  { %v3511_v9 = vadd.f32 %v2096_v8, %v1696_v58  ;;  %v190_v10 = vpop.f32.mrb[7].mxu1  ;;  %v799_v8 = vld [vmem:[#allocation4 + $0xb0] sm:$0xff] }
 0x12a   :  { %v3513_v11 = vadd.f32 %v1696_v58, %v190_v10  ;;  %v790_v58 = vld [vmem:[#allocation2 + $0xf0] sm:$0xff]  ;;  %v800_v10 = vld [vmem:[#allocation4 + $0xb8] sm:$0xff] }
 0x13c   :  { %v265_v13 = vpop.f32.mrb[8].mxu1 }
 0x13d   :  { %v269_v14 = vadd.f32 %v265_v13, %v161_v12  ;;  %v2131_v15 = vpop.f32.mrb[9].mxu1  ;;  %v3640_v12 = vpack.c.bf16 %v800_v10, %v799_v8  ;;  %v801_v13 = vld [vmem:[#allocation4 + $0xc0] sm:$0xff]  ;;  %v1503_v10 = vld [vmem:[#allocation2 + $0x110] sm:$0xff] }
 0x13f   :  { %3232 = vtanh.f32 %v269_v14  ;;  %v802_v14 = vld [vmem:[#allocation4 + $0xc8] sm:$0xff] }
 0x140   :  { %v3644_v15 = vpack.c.bf16 %v802_v14, %v801_v13 }
 0x149   :  { %v3515_v17 = vpop.eup %3232 }
 0x14a   :  { %2165 = vmatmul.mubr.f32.vlgmr.msra.gmra.mrb[0].mxu0 %v3515_v17 }
 0x14b   :  { %2851 = vmatpush3.bf16.msra.mxu0 %v3411_v16  ;;  %2234 = vmatprep.mubr.msk.f32.mxu0 %vm3349_vm0, %v3350_v1 }
 0x14c   :  { %2852 = vmatprep.subr.bf16.mxu0 %v3348_v0 }
 0x14f   :  { %2854 = vmatpush3.bf16.msra.mxu0 %v3415_v22 }
 0x150   :  { %2855 = vmatprep.subr.bf16.mxu0 %v3348_v0 }
 0x153   :  { %2857 = vmatpush3.bf16.msra.mxu0 %v3419_v28 }
 0x154   :  { %2858 = vmatprep.subr.bf16.mxu0 %v3348_v0 }
 0x157   :  { %2860 = vmatpush3.bf16.msra.mxu0 %v3423_v34 }
 0x158   :  { %2861 = vmatprep.subr.bf16.mxu0 %v3348_v0 }
 0x15b   :  { %2863 = vmatpush3.bf16.msra.mxu0 %v3427_v40 }
 0x15c   :  { %2864 = vmatprep.subr.bf16.mxu0 %v3348_v0 }
 0x15f   :  { %2866 = vmatpush3.bf16.msra.mxu0 %v3431_v44 }
 0x160   :  { %2867 = vmatprep.subr.bf16.mxu0 %v3348_v0 }
 0x163   :  { %2869 = vmatpush3.bf16.msra.mxu0 %v3435_v47 }
 0x164   :  { %2870 = vmatprep.subr.bf16.mxu0 %v3348_v0 }
 0x167   :  { %2872 = vmatpush3.bf16.msra.mxu0 %v3446_v52 }
 0x168   :  { %2897 = vmatprep.subr.bf16.mxu0 %v3348_v0 }
 0x21d   :  { %v337_v18 = vpop.f32.mrb[0].mxu0 }
 0x21e   :  { %v341_v19 = vadd.f32 %v337_v18, %v166_v60  ;;  %v2166_v20 = vpop.f32.mrb[1].mxu0  ;;  %v2997_v60 = vpack.c.bf16 %v791_v59, %v790_v58  ;;  %v804_v18 = vld [vmem:[#allocation4 + $0xd8] sm:$0xff] }
 0x21f   :  { %v805_v20 = vld [vmem:[#allocation4 + $0xe0] sm:$0xff] }
 0x220   :  { %3234 = vtanh.f32 %v341_v19 }
 0x22a   :  { %v3536_v21 = vpop.eup %3234 }
 0x22b   :  { %2200 = vmatmul.mubr.f32.vlgmr.msra.gmra.mrb[10].mxu1 %v3536_v21 }
 0x22c   :  { %2875 = vmatpush3.bf16.msra.mxu1 %v3411_v16  ;;  %2269 = vmatprep.mubr.msk.f32.mxu1 %vm3349_vm0, %v3350_v1 }
 0x22d   :  { %2876 = vmatprep.subr.bf16.mxu1 %v3348_v0 }
 0x230   :  { %2878 = vmatpush3.bf16.msra.mxu1 %v3415_v22 }
 0x231   :  { %2879 = vmatprep.subr.bf16.mxu1 %v3348_v0 }
 0x234   :  { %2881 = vmatpush3.bf16.msra.mxu1 %v3419_v28 }
 0x235   :  { %2882 = vmatprep.subr.bf16.mxu1 %v3348_v0 }
 0x238   :  { %2884 = vmatpush3.bf16.msra.mxu1 %v3423_v34 }
 0x239   :  { %2885 = vmatprep.subr.bf16.mxu1 %v3348_v0 }
 0x23c   :  { %2887 = vmatpush3.bf16.msra.mxu1 %v3427_v40 }
 0x23d   :  { %2888 = vmatprep.subr.bf16.mxu1 %v3348_v0 }
 0x240   :  { %2890 = vmatpush3.bf16.msra.mxu1 %v3431_v44 }
 0x241   :  { %2891 = vmatprep.subr.bf16.mxu1 %v3348_v0 }
 0x244   :  { %2893 = vmatpush3.bf16.msra.mxu1 %v3435_v47 }
 0x245   :  { %2894 = vmatprep.subr.bf16.mxu1 %v3348_v0 }
 0x248   :  { %2896 = vmatpush3.bf16.msra.mxu1 %v3446_v52 }
 0x249   :  { %2921 = vmatprep.subr.bf16.mxu1 %v3348_v0 }
 0x2fe   :  { %v409_v23 = vpop.f32.mrb[10].mxu1 }
 0x2ff   :  { %v413_v24 = vadd.f32 %v409_v23, %v171_v3  ;;  %v2201_v25 = vpop.f32.mrb[11].mxu1  ;;  %v796_v3 = vld [vmem:[#allocation4 + $0x98] sm:$0xff] }
 0x300   :  { %v3632_v4 = vpack.c.bf16 %v796_v3, %v795_v2  ;;  %v808_v25 = vld [vmem:[#allocation4 + $0xf8] sm:$0xff] }
 0x301   :  { %3236 = vtanh.f32 %v413_v24  ;;  %v807_v24 = vld [vmem:[#allocation4 + $0xf0] sm:$0xff] }
 0x30b   :  { %v3557_v26 = vpop.eup %3236 }
 0x30c   :  { %2235 = vmatmul.mubr.f32.vlgmr.msra.gmra.mrb[2].mxu0 %v3557_v26 }
 0x30d   :  { %2899 = vmatpush3.bf16.msra.mxu0 %v3411_v16  ;;  %2304 = vmatprep.mubr.msk.f32.mxu0 %vm3349_vm0, %v3350_v1 }
 0x30e   :  { %2900 = vmatprep.subr.bf16.mxu0 %v3348_v0 }
 0x311   :  { %2902 = vmatpush3.bf16.msra.mxu0 %v3415_v22 }
 0x312   :  { %2903 = vmatprep.subr.bf16.mxu0 %v3348_v0 }
 0x315   :  { %2905 = vmatpush3.bf16.msra.mxu0 %v3419_v28 }
 0x316   :  { %2906 = vmatprep.subr.bf16.mxu0 %v3348_v0 }
 0x319   :  { %2908 = vmatpush3.bf16.msra.mxu0 %v3423_v34 }
 0x31a   :  { %2909 = vmatprep.subr.bf16.mxu0 %v3348_v0 }
 0x31d   :  { %2911 = vmatpush3.bf16.msra.mxu0 %v3427_v40 }
 0x31e   :  { %2912 = vmatprep.subr.bf16.mxu0 %v3348_v0 }
 0x321   :  { %2914 = vmatpush3.bf16.msra.mxu0 %v3431_v44 }
 0x322   :  { %2915 = vmatprep.subr.bf16.mxu0 %v3348_v0 }
 0x325   :  { %2917 = vmatpush3.bf16.msra.mxu0 %v3435_v47 }
 0x326   :  { %2918 = vmatprep.subr.bf16.mxu0 %v3348_v0 }
 0x329   :  { %2920 = vmatpush3.bf16.msra.mxu0 %v3446_v52 }
 0x32a   :  { %2945 = vmatprep.subr.bf16.mxu0 %v3348_v0 }
 0x3df   :  { %v481_v27 = vpop.f32.mrb[2].mxu0 }
 0x3e0   :  { %v485_v29 = vadd.f32 %v481_v27, %v3505_v63  ;;  %v2236_v30 = vpop.f32.mrb[3].mxu0  ;;  %v3628_v63 = vpack.c.bf16 %v794_v62, %v793_v61 }
 0x3e2   :  { %3238 = vtanh.f32 %v485_v29 }
 0x3ec   :  { %v3579_v31 = vpop.eup %3238 }
 0x3ed   :  { %2270 = vmatmul.mubr.f32.vlgmr.msra.gmra.mrb[12].mxu1 %v3579_v31 }
 0x3ee   :  { %2923 = vmatpush3.bf16.msra.mxu1 %v3411_v16  ;;  %2339 = vmatprep.mubr.msk.f32.mxu1 %vm3349_vm0, %v3350_v1 }
 0x3ef   :  { %2924 = vmatprep.subr.bf16.mxu1 %v3348_v0 }
 0x3f2   :  { %2926 = vmatpush3.bf16.msra.mxu1 %v3415_v22 }
 0x3f3   :  { %2927 = vmatprep.subr.bf16.mxu1 %v3348_v0 }
 0x3f6   :  { %2929 = vmatpush3.bf16.msra.mxu1 %v3419_v28 }
 0x3f7   :  { %2930 = vmatprep.subr.bf16.mxu1 %v3348_v0 }
 0x3fa   :  { %2932 = vmatpush3.bf16.msra.mxu1 %v3423_v34 }
 0x3fb   :  { %2933 = vmatprep.subr.bf16.mxu1 %v3348_v0 }
 0x3fe   :  { %2935 = vmatpush3.bf16.msra.mxu1 %v3427_v40 }
 0x3ff   :  { %2936 = vmatprep.subr.bf16.mxu1 %v3348_v0 }
 0x402   :  { %2938 = vmatpush3.bf16.msra.mxu1 %v3431_v44 }
 0x403   :  { %2939 = vmatprep.subr.bf16.mxu1 %v3348_v0 }
 0x406   :  { %2941 = vmatpush3.bf16.msra.mxu1 %v3435_v47 }
 0x407   :  { %2942 = vmatprep.subr.bf16.mxu1 %v3348_v0 }
 0x40a   :  { %2944 = vmatpush3.bf16.msra.mxu1 %v3446_v52 }
 0x4c0   :  { %v553_v32 = vpop.f32.mrb[12].mxu1 }
 0x4c1   :  { %v557_v33 = vadd.f32 %v553_v32, %v3509_v7  ;;  %v2271_v35 = vpop.f32.mrb[13].mxu1 }
 0x4c3   :  { %3240 = vtanh.f32 %v557_v33 }
 0x4cd   :  { %v3600_v36 = vpop.eup %3240 }
 0x4ce   :  { %2305 = vmatmul.mubr.f32.vlgmr.msra.gmra.mrb[4].mxu0 %v3600_v36 }
 0x4cf   :  { %2947 = vmatpush3.bf16.msra.mxu0 %v3411_v16  ;;  %2374 = vmatprep.mubr.msk.f32.mxu0 %vm3349_vm0, %v3350_v1  ;;  %v776_v16 = vld [vmem:[#allocation2 + $0x80] sm:$0xff] }
 0x4d0   :  { %2948 = vmatprep.subr.bf16.mxu0 %v3348_v0 }
 0x4d3   :  { %2950 = vmatpush3.bf16.msra.mxu0 %v3415_v22  ;;  %v777_v22 = vld [vmem:[#allocation2 + $0x88] sm:$0xff] }
 0x4d4   :  { %2951 = vmatprep.subr.bf16.mxu0 %v3348_v0 }
 0x4d7   :  { %2953 = vmatpush3.bf16.msra.mxu0 %v3419_v28  ;;  %v2969_v28 = vpack.c.bf16 %v777_v22, %v776_v16 }
 0x4d8   :  { %2954 = vmatprep.subr.bf16.mxu0 %v3348_v0 }
 0x4d9   :  { %2970 = vmatprep.subr.bf16.mxu1 %v2969_v28 }
 0x4db   :  { %2956 = vmatpush3.bf16.msra.mxu0 %v3423_v34 }
 0x4dc   :  { %2957 = vmatprep.subr.bf16.mxu0 %v3348_v0 }
 0x4df   :  { %2959 = vmatpush3.bf16.msra.mxu0 %v3427_v40  ;;  %v779_v40 = vld [vmem:[#allocation2 + $0x98] sm:$0xff] }
 0x4e0   :  { %2960 = vmatprep.subr.bf16.mxu0 %v3348_v0  ;;  %v2973_v41 = vpack.c.bf16 %v779_v40, %v778_v39 }
 0x4e3   :  { %2962 = vmatpush3.bf16.msra.mxu0 %v3431_v44  ;;  %v781_v44 = vld [vmem:[#allocation2 + $0xa8] sm:$0xff] }
 0x4e4   :  { %2963 = vmatprep.subr.bf16.mxu0 %v3348_v0  ;;  %v2977_v45 = vpack.c.bf16 %v781_v44, %v780_v43 }
 0x4e7   :  { %2965 = vmatpush3.bf16.msra.mxu0 %v3435_v47  ;;  %v783_v47 = vld [vmem:[#allocation2 + $0xb8] sm:$0xff] }
 0x4e8   :  { %2966 = vmatprep.subr.bf16.mxu0 %v3348_v0  ;;  %v2981_v48 = vpack.c.bf16 %v783_v47, %v782_v46 }
 0x4eb   :  { %2968 = vmatpush3.bf16.msra.mxu0 %v3446_v52  ;;  %v786_v52 = vld [vmem:[#allocation2 + $0xd0] sm:$0xff] }
 0x4ec   :  { %3001 = vmatprep.subr.bf16.mxu0 %v3348_v0  ;;  %v2989_v54 = vpack.c.bf16 %v787_v53, %v786_v52 }
 0x5a1   :  { %v625_v34 = vpop.f32.mrb[4].mxu0 }
 0x5a2   :  { %v629_v37 = vadd.f32 %v625_v34, %v3507_v5  ;;  %v2306_v38 = vpop.f32.mrb[5].mxu0  ;;  %v797_v5 = vld [vmem:[#allocation4 + $0xa0] sm:$0xff] }
 0x5a3   :  { %v3636_v7 = vpack.c.bf16 %v798_v6, %v797_v5  ;;  %v3717_v38 = vld [vmem:[%s3889_s3 + $0x1] ss:$0 sm:$0xff] }
 0x5a4   :  { %3242 = vtanh.f32 %v629_v37 }
 0x5ae   :  { %v3243_v42 = vpop.eup %3242 }
 0x5af   :  { %2340 = vmatmul.mubr.f32.vlgmr.msra.gmra.mrb[14].mxu1 %v3243_v42 }
 0x5b0   :  { %2972 = vmatpush3.bf16.msra.mxu1 %v2969_v28  ;;  %2409 = vmatprep.mubr.f32.mxu1 %v3515_v17  ;;  %v803_v17 = vld [vmem:[#allocation4 + $0xd0] sm:$0xff] }
 0x5b1   :  { %2974 = vmatprep.subr.bf16.mxu1 %v2973_v41  ;;  %v3648_v19 = vpack.c.bf16 %v804_v18, %v803_v17  ;;  %v1506_v17 = vld [vmem:[#allocation2 + $0x128] sm:$0xff]  ;;  %v1507_v18 = vld [vmem:[#allocation2 + $0x130] sm:$0xff] }
 0x5b4   :  { %2976 = vmatpush3.bf16.msra.mxu1 %v2973_v41 }
 0x5b5   :  { %2978 = vmatprep.subr.bf16.mxu1 %v2977_v45 }
 0x5b8   :  { %2980 = vmatpush3.bf16.msra.mxu1 %v2977_v45 }
 0x5b9   :  { %2982 = vmatprep.subr.bf16.mxu1 %v2981_v48 }
 0x5bc   :  { %2984 = vmatpush3.bf16.msra.mxu1 %v2981_v48 }
 0x5bd   :  { %2986 = vmatprep.subr.bf16.mxu1 %v2985_v51 }
 0x5c0   :  { %2988 = vmatpush3.bf16.msra.mxu1 %v2985_v51 }
 0x5c1   :  { %2990 = vmatprep.subr.bf16.mxu1 %v2989_v54 }
 0x5c4   :  { %2992 = vmatpush3.bf16.msra.mxu1 %v2989_v54 }
 0x5c5   :  { %2994 = vmatprep.subr.bf16.mxu1 %v2993_v57 }
 0x5c8   :  { %2996 = vmatpush3.bf16.msra.mxu1 %v2993_v57 }
 0x5c9   :  { %2998 = vmatprep.subr.bf16.mxu1 %v2997_v60 }
 0x5cc   :  { %3000 = vmatpush3.bf16.msra.mxu1 %v2997_v60 }
 0x5cd   :  { %3025 = vmatprep.subr.bf16.mxu1 %v3348_v0 }
 0x5cf   :  { %2410 = vmatmul.mubr.f32.vlgmr.msra.gmra.mrb[16].mxu1 %v3536_v21  ;;  %v806_v21 = vld [vmem:[#allocation4 + $0xe8] sm:$0xff] }
 0x5d0   :  { %2412 = vmatprep.mubr.f32.mxu1 %v3557_v26  ;;  %3027 = vmatpush3.bf16.msra.mxu1 %v3628_v63  ;;  %v3652_v23 = vpack.c.bf16 %v806_v21, %v805_v20  ;;  %v3656_v26 = vpack.c.bf16 %v808_v25, %v807_v24  ;;  %v1509_v21 = vld [vmem:[#allocation2 + $0x140] sm:$0xff]  ;;  %v1511_v25 = vld [vmem:[#allocation2 + $0x150] sm:$0xff] }
 0x5d1   :  { %3028 = vmatprep.subr.bf16.mxu1 %v3348_v0 }
 0x5d3   :  { %2413 = vmatmul.mubr.f32.gmra.mrb[18].mxu1 %v3579_v31 }
 0x5d4   :  { %2415 = vmatprep.mubr.f32.mxu1 %v3600_v36  ;;  %3030 = vmatpush3.bf16.msra.mxu1 %v3632_v4 }
 0x5d5   :  { %3031 = vmatprep.subr.bf16.mxu1 %v3348_v0 }
 0x5d7   :  { %2416 = vmatmul.mubr.f32.gmra.mrb[20].mxu1 %v3243_v42 }
 0x5d8   :  { %3033 = vmatpush3.bf16.msra.mxu1 %v3636_v7 }
 0x5d9   :  { %3034 = vmatprep.subr.bf16.mxu1 %v3348_v0 }
 0x5dc   :  { %3036 = vmatpush3.bf16.msra.mxu1 %v3640_v12 }
 0x5dd   :  { %3037 = vmatprep.subr.bf16.mxu1 %v3348_v0 }
 0x5e0   :  { %3039 = vmatpush3.bf16.msra.mxu1 %v3644_v15 }
 0x5e1   :  { %3040 = vmatprep.subr.bf16.mxu1 %v3348_v0 }
 0x5e4   :  { %3042 = vmatpush3.bf16.msra.mxu1 %v3648_v19 }
 0x5e5   :  { %3043 = vmatprep.subr.bf16.mxu1 %v3348_v0 }
 0x5e8   :  { %3045 = vmatpush3.bf16.msra.mxu1 %v3652_v23 }
 0x5e9   :  { %3046 = vmatprep.subr.bf16.mxu1 %v3348_v0 }
 0x5ec   :  { %3048 = vmatpush3.bf16.msra.mxu1 %v3656_v26 }
 0x5ed   :  { %3073 = vmatprep.subr.bf16.mxu1 %v3348_v0 }
 0x682   :  { %v697_v27 = vpop.f32.mrb[14].mxu1 }
 0x683   :  { %v701_v29 = vadd.f32 %v697_v27, %v3513_v11  ;;  %v2341_v30 = vpop.f32.mrb[15].mxu1 }
 0x684   :  { %v1514_v30 = vld [vmem:[#allocation2 + $0x168] sm:$0xff] }
 0x685   :  { %3244 = vtanh.f32 %v701_v29  ;;  %v1513_v29 = vld [vmem:[#allocation2 + $0x160] sm:$0xff] }
 0x68f   :  { %v3245_v31 = vpop.eup %3244 }
 0x690   :  { %2375 = vmatmul.mubr.f32.vlgmr.msra.gmra.mrb[6].mxu0 %v3245_v31  ;;  %2418 = vmatprep.mubr.f32.mxu1 %v3245_v31  ;;  %v3217_v31 = vpack.c.bf16 %v1514_v30, %v1513_v29 }
 0x691   :  { %3003 = vmatpush3.bf16.msra.mxu0 %v3628_v63  ;;  %2453 = vmatprep.mubr.msk.f32.mxu0 %vm3349_vm0, %v3350_v1 }
 0x692   :  { %3004 = vmatprep.subr.bf16.mxu0 %v3348_v0 }
 0x695   :  { %3006 = vmatpush3.bf16.msra.mxu0 %v3632_v4 }
 0x696   :  { %3007 = vmatprep.subr.bf16.mxu0 %v3348_v0 }
 0x699   :  { %3009 = vmatpush3.bf16.msra.mxu0 %v3636_v7 }
 0x69a   :  { %3010 = vmatprep.subr.bf16.mxu0 %v3348_v0 }
 0x69d   :  { %3012 = vmatpush3.bf16.msra.mxu0 %v3640_v12 }
 0x69e   :  { %3013 = vmatprep.subr.bf16.mxu0 %v3348_v0 }
 0x6a1   :  { %3015 = vmatpush3.bf16.msra.mxu0 %v3644_v15 }
 0x6a2   :  { %v3672_v11 = vpop.f32.mrb[16].mxu1  ;;  %3016 = vmatprep.subr.bf16.mxu0 %v3348_v0 }
 0x6a3   :  { %v883_v32 = vpop.f32.mrb[17].mxu1  ;;  %v889_v45 = vadd.f32 %v3672_v11, %v3717_v38  ;;  %v1515_v11 = vld [vmem:[#allocation2 + $0x170] sm:$0xff] }
 0x6a4   :  { %v884_v39 = vadd.f32 %v3717_v38, %v883_v32  ;;  %v1516_v32 = vld [vmem:[#allocation2 + $0x178] sm:$0xff] }
 0x6a5   :  { %3018 = vmatpush3.bf16.msra.mxu0 %v3648_v19 }
 0x6a6   :  { %v3676_v33 = vpop.f32.mrb[18].mxu1  ;;  %3019 = vmatprep.subr.bf16.mxu0 %v3348_v0 }
 0x6a7   :  { %v3679_v35 = vpop.f32.mrb[19].mxu1  ;;  %v899_v55 = vadd.f32 %v3676_v33, %v3717_v38  ;;  %v3221_v33 = vpack.c.bf16 %v1516_v32, %v1515_v11 }
 0x6a8   :  { %v894_v50 = vadd.f32 %v3717_v38, %v3679_v35 }
 0x6a9   :  { %3021 = vmatpush3.bf16.msra.mxu0 %v3652_v23 }
 0x6aa   :  { %v3682_v36 = vpop.f32.mrb[20].mxu1  ;;  %3022 = vmatprep.subr.bf16.mxu0 %v3348_v0 }
 0x6ab   :  { %v3685_v16 = vpop.f32.mrb[21].mxu1  ;;  %v909_v5 = vadd.f32 %v3682_v36, %v3717_v38 }
 0x6ac   :  { %v904_v60 = vadd.f32 %v3717_v38, %v3685_v16 }
 0x6ad   :  { %3024 = vmatpush3.bf16.msra.mxu0 %v3656_v26 }
 0x6ae   :  { %3049 = vmatprep.subr.bf16.mxu0 %v3348_v0 }
 0x6b0   :  { %2454 = vmatmul.mubr.f32.vlgmr.msra.gmra.mrb[8].mxu0 %v3350_v1 }
 0x6b1   :  { %3051 = vmatpush3.bf16.msra.mxu0 %v3628_v63  ;;  %2523 = vmatprep.mubr.msk.f32.mxu0 %vm3349_vm0, %v3350_v1 }
 0x6b2   :  { %3052 = vmatprep.subr.bf16.mxu0 %v3348_v0 }
 0x6b5   :  { %3054 = vmatpush3.bf16.msra.mxu0 %v3632_v4 }
 0x6b6   :  { %3055 = vmatprep.subr.bf16.mxu0 %v3348_v0 }
 0x6b9   :  { %3057 = vmatpush3.bf16.msra.mxu0 %v3636_v7 }
 0x6ba   :  { %3058 = vmatprep.subr.bf16.mxu0 %v3348_v0 }
 0x6bd   :  { %3060 = vmatpush3.bf16.msra.mxu0 %v3640_v12 }
 0x6be   :  { %3061 = vmatprep.subr.bf16.mxu0 %v3348_v0 }
 0x6c1   :  { %3063 = vmatpush3.bf16.msra.mxu0 %v3644_v15 }
 0x6c2   :  { %3064 = vmatprep.subr.bf16.mxu0 %v3348_v0 }
 0x6c5   :  { %3066 = vmatpush3.bf16.msra.mxu0 %v3648_v19 }
 0x6c6   :  { %3067 = vmatprep.subr.bf16.mxu0 %v3348_v0 }
 0x6c9   :  { %3069 = vmatpush3.bf16.msra.mxu0 %v3652_v23 }
 0x6ca   :  { %3070 = vmatprep.subr.bf16.mxu0 %v3348_v0 }
 0x6cd   :  { %3072 = vmatpush3.bf16.msra.mxu0 %v3656_v26 }
 0x6ce   :  { %3097 = vmatprep.subr.bf16.mxu0 %v3348_v0 }
 0x763   :  { %v769_v22 = vpop.f32.mrb[6].mxu0 }
 0x764   :  { %v773_v28 = vadd.f32 %v769_v22, %v3511_v9  ;;  %v2376_v34 = vpop.f32.mrb[7].mxu0 }
 0x765   :  { %v3847_v34 = vld [vmem:[%s3889_s3 + $0x2] ss:$0 sm:$0xff] }
 0x766   :  { %3246 = vtanh.f32 %v773_v28 }
 0x770   :  { %v3247_v37 = vpop.eup %3246 }
 0x771   :  { %1498 = vst [vmem:[%s3891_s5] sm:$0xff] %v3247_v37  ;;  %2419 = vmatmul.mubr.f32.gmra.mrb[22].mxu1 %v3247_v37 }
 0x772   :  { %2488 = vmatprep.mubr.msk.f32.mxu1 %vm3349_vm0, %v3350_v1 }
 0x783   :  { %v988_v40 = vpop.f32.mrb[8].mxu0 }
 0x784   :  { %v992_v9 = vadd.f32 %v988_v40, %v884_v39  ;;  %v2455_v41 = vpop.f32.mrb[9].mxu0 }
 0x786   :  { %3248 = vtanh.f32 %v992_v9 }
 0x790   :  { %v3720_v42 = vpop.eup %3248 }
 0x791   :  { %2489 = vmatmul.mubr.f32.vlgmr.msra.gmra.mrb[24].mxu1 %v3720_v42 }
 0x792   :  { %3075 = vmatpush3.bf16.msra.mxu1 %v3628_v63  ;;  %2558 = vmatprep.mubr.msk.f32.mxu1 %vm3349_vm0, %v3350_v1 }
 0x793   :  { %3076 = vmatprep.subr.bf16.mxu1 %v3348_v0 }
 0x796   :  { %3078 = vmatpush3.bf16.msra.mxu1 %v3632_v4 }
 0x797   :  { %3079 = vmatprep.subr.bf16.mxu1 %v3348_v0 }
 0x79a   :  { %3081 = vmatpush3.bf16.msra.mxu1 %v3636_v7 }
 0x79b   :  { %3082 = vmatprep.subr.bf16.mxu1 %v3348_v0 }
 0x79e   :  { %3084 = vmatpush3.bf16.msra.mxu1 %v3640_v12 }
 0x79f   :  { %3085 = vmatprep.subr.bf16.mxu1 %v3348_v0 }
 0x7a2   :  { %3087 = vmatpush3.bf16.msra.mxu1 %v3644_v15 }
 0x7a3   :  { %3088 = vmatprep.subr.bf16.mxu1 %v3348_v0 }
 0x7a6   :  { %3090 = vmatpush3.bf16.msra.mxu1 %v3648_v19 }
 0x7a7   :  { %3091 = vmatprep.subr.bf16.mxu1 %v3348_v0 }
 0x7aa   :  { %3093 = vmatpush3.bf16.msra.mxu1 %v3652_v23 }
 0x7ab   :  { %3094 = vmatprep.subr.bf16.mxu1 %v3348_v0 }
 0x7ae   :  { %3096 = vmatpush3.bf16.msra.mxu1 %v3656_v26 }
 0x7af   :  { %3121 = vmatprep.subr.bf16.mxu1 %v3348_v0 }
 0x844   :  { %v3741_v43 = vpop.f32.mrb[22].mxu1 }
 0x845   :  { %v3743_v44 = vpop.f32.mrb[23].mxu1 }
 0x846   :  { %v914_v35 = vadd.f32 %v3717_v38, %v3743_v44 }
 0x864   :  { %v1060_v46 = vpop.f32.mrb[24].mxu1 }
 0x865   :  { %v1064_v47 = vadd.f32 %v1060_v46, %v889_v45  ;;  %v2490_v48 = vpop.f32.mrb[25].mxu1 }
 0x867   :  { %3250 = vtanh.f32 %v1064_v47 }
 0x871   :  { %v3747_v49 = vpop.eup %3250 }
 0x872   :  { %2524 = vmatmul.mubr.f32.vlgmr.msra.gmra.mrb[10].mxu0 %v3747_v49 }
 0x873   :  { %3099 = vmatpush3.bf16.msra.mxu0 %v3628_v63  ;;  %2593 = vmatprep.mubr.msk.f32.mxu0 %vm3349_vm0, %v3350_v1 }
 0x874   :  { %3100 = vmatprep.subr.bf16.mxu0 %v3348_v0 }
 0x877   :  { %3102 = vmatpush3.bf16.msra.mxu0 %v3632_v4 }
 0x878   :  { %3103 = vmatprep.subr.bf16.mxu0 %v3348_v0 }
 0x87b   :  { %3105 = vmatpush3.bf16.msra.mxu0 %v3636_v7 }
 0x87c   :  { %3106 = vmatprep.subr.bf16.mxu0 %v3348_v0 }
 0x87f   :  { %3108 = vmatpush3.bf16.msra.mxu0 %v3640_v12 }
 0x880   :  { %3109 = vmatprep.subr.bf16.mxu0 %v3348_v0 }
 0x883   :  { %3111 = vmatpush3.bf16.msra.mxu0 %v3644_v15 }
 0x884   :  { %3112 = vmatprep.subr.bf16.mxu0 %v3348_v0 }
 0x887   :  { %3114 = vmatpush3.bf16.msra.mxu0 %v3648_v19 }
 0x888   :  { %3115 = vmatprep.subr.bf16.mxu0 %v3348_v0 }
 0x88b   :  { %3117 = vmatpush3.bf16.msra.mxu0 %v3652_v23 }
 0x88c   :  { %3118 = vmatprep.subr.bf16.mxu0 %v3348_v0 }
 0x88f   :  { %3120 = vmatpush3.bf16.msra.mxu0 %v3656_v26 }
 0x890   :  { %3145 = vmatprep.subr.bf16.mxu0 %v3348_v0 }
 0x945   :  { %v1132_v51 = vpop.f32.mrb[10].mxu0 }
 0x946   :  { %v1136_v52 = vadd.f32 %v1132_v51, %v894_v50  ;;  %v2525_v53 = vpop.f32.mrb[11].mxu0 }
 0x948   :  { %3252 = vtanh.f32 %v1136_v52 }
 0x952   :  { %v3770_v54 = vpop.eup %3252 }
 0x953   :  { %2559 = vmatmul.mubr.f32.vlgmr.msra.gmra.mrb[26].mxu1 %v3770_v54 }
 0x954   :  { %3123 = vmatpush3.bf16.msra.mxu1 %v3628_v63  ;;  %2628 = vmatprep.mubr.msk.f32.mxu1 %vm3349_vm0, %v3350_v1 }
 0x955   :  { %3124 = vmatprep.subr.bf16.mxu1 %v3348_v0 }
 0x958   :  { %3126 = vmatpush3.bf16.msra.mxu1 %v3632_v4 }
 0x959   :  { %3127 = vmatprep.subr.bf16.mxu1 %v3348_v0 }
 0x95c   :  { %3129 = vmatpush3.bf16.msra.mxu1 %v3636_v7 }
 0x95d   :  { %3130 = vmatprep.subr.bf16.mxu1 %v3348_v0 }
 0x960   :  { %3132 = vmatpush3.bf16.msra.mxu1 %v3640_v12 }
 0x961   :  { %3133 = vmatprep.subr.bf16.mxu1 %v3348_v0 }
 0x964   :  { %3135 = vmatpush3.bf16.msra.mxu1 %v3644_v15 }
 0x965   :  { %3136 = vmatprep.subr.bf16.mxu1 %v3348_v0 }
 0x968   :  { %3138 = vmatpush3.bf16.msra.mxu1 %v3648_v19 }
 0x969   :  { %3139 = vmatprep.subr.bf16.mxu1 %v3348_v0 }
 0x96c   :  { %3141 = vmatpush3.bf16.msra.mxu1 %v3652_v23 }
 0x96d   :  { %3142 = vmatprep.subr.bf16.mxu1 %v3348_v0 }
 0x970   :  { %3144 = vmatpush3.bf16.msra.mxu1 %v3656_v26 }
 0x971   :  { %3169 = vmatprep.subr.bf16.mxu1 %v3348_v0 }
 0xa26   :  { %v1204_v56 = vpop.f32.mrb[26].mxu1 }
 0xa27   :  { %v1208_v57 = vadd.f32 %v1204_v56, %v899_v55  ;;  %v2560_v58 = vpop.f32.mrb[27].mxu1 }
 0xa29   :  { %3254 = vtanh.f32 %v1208_v57 }
 0xa33   :  { %v3793_v59 = vpop.eup %3254 }
 0xa34   :  { %2594 = vmatmul.mubr.f32.vlgmr.msra.gmra.mrb[12].mxu0 %v3793_v59 }
 0xa35   :  { %3147 = vmatpush3.bf16.msra.mxu0 %v3628_v63  ;;  %2663 = vmatprep.mubr.msk.f32.mxu0 %vm3349_vm0, %v3350_v1 }
 0xa36   :  { %3148 = vmatprep.subr.bf16.mxu0 %v3348_v0 }
 0xa39   :  { %3150 = vmatpush3.bf16.msra.mxu0 %v3632_v4 }
 0xa3a   :  { %3151 = vmatprep.subr.bf16.mxu0 %v3348_v0 }
 0xa3d   :  { %3153 = vmatpush3.bf16.msra.mxu0 %v3636_v7 }
 0xa3e   :  { %3154 = vmatprep.subr.bf16.mxu0 %v3348_v0 }
 0xa41   :  { %3156 = vmatpush3.bf16.msra.mxu0 %v3640_v12 }
 0xa42   :  { %3157 = vmatprep.subr.bf16.mxu0 %v3348_v0 }
 0xa45   :  { %3159 = vmatpush3.bf16.msra.mxu0 %v3644_v15 }
 0xa46   :  { %3160 = vmatprep.subr.bf16.mxu0 %v3348_v0 }
 0xa49   :  { %3162 = vmatpush3.bf16.msra.mxu0 %v3648_v19 }
 0xa4a   :  { %3163 = vmatprep.subr.bf16.mxu0 %v3348_v0 }
 0xa4d   :  { %3165 = vmatpush3.bf16.msra.mxu0 %v3652_v23 }
 0xa4e   :  { %3166 = vmatprep.subr.bf16.mxu0 %v3348_v0 }
 0xa51   :  { %3168 = vmatpush3.bf16.msra.mxu0 %v3656_v26 }
 0xb07   :  { %v1276_v61 = vpop.f32.mrb[12].mxu0 }
 0xb08   :  { %v1280_v62 = vadd.f32 %v1276_v61, %v904_v60  ;;  %v2595_v2 = vpop.f32.mrb[13].mxu0 }
 0xb0a   :  { %3256 = vtanh.f32 %v1280_v62 }
 0xb14   :  { %v3815_v3 = vpop.eup %3256 }
 0xb15   :  { %2629 = vmatmul.mubr.f32.vlgmr.msra.gmra.mrb[28].mxu1 %v3815_v3 }
 0xb16   :  { %3171 = vmatpush3.bf16.msra.mxu1 %v3628_v63  ;;  %2698 = vmatprep.mubr.msk.f32.mxu1 %vm3349_vm0, %v3350_v1  ;;  %v1501_v1 = vld [vmem:[#allocation2 + $0x100] sm:$0xff]  ;;  %v1502_v63 = vld [vmem:[#allocation2 + $0x108] sm:$0xff] }
 0xb17   :  { %3172 = vmatprep.subr.bf16.mxu1 %v3348_v0 }
 0xb1a   :  { %3174 = vmatpush3.bf16.msra.mxu1 %v3632_v4  ;;  %v3193_v4 = vpack.c.bf16 %v1502_v63, %v1501_v1 }
 0xb1b   :  { %3175 = vmatprep.subr.bf16.mxu1 %v3348_v0 }
 0xb1c   :  { %3194 = vmatprep.subr.bf16.mxu0 %v3193_v4 }
 0xb1e   :  { %3177 = vmatpush3.bf16.msra.mxu1 %v3636_v7 }
 0xb1f   :  { %3178 = vmatprep.subr.bf16.mxu1 %v3348_v0 }
 0xb22   :  { %3180 = vmatpush3.bf16.msra.mxu1 %v3640_v12  ;;  %v1504_v12 = vld [vmem:[#allocation2 + $0x118] sm:$0xff] }
 0xb23   :  { %3181 = vmatprep.subr.bf16.mxu1 %v3348_v0  ;;  %v3197_v13 = vpack.c.bf16 %v1504_v12, %v1503_v10 }
 0xb26   :  { %3183 = vmatpush3.bf16.msra.mxu1 %v3644_v15  ;;  %v1505_v15 = vld [vmem:[#allocation2 + $0x120] sm:$0xff] }
 0xb27   :  { %3184 = vmatprep.subr.bf16.mxu1 %v3348_v0 }
 0xb2a   :  { %3186 = vmatpush3.bf16.msra.mxu1 %v3648_v19  ;;  %v1508_v19 = vld [vmem:[#allocation2 + $0x138] sm:$0xff] }
 0xb2b   :  { %3187 = vmatprep.subr.bf16.mxu1 %v3348_v0  ;;  %v3205_v20 = vpack.c.bf16 %v1508_v19, %v1507_v18 }
 0xb2e   :  { %3189 = vmatpush3.bf16.msra.mxu1 %v3652_v23  ;;  %v1510_v23 = vld [vmem:[#allocation2 + $0x148] sm:$0xff] }
 0xb2f   :  { %3190 = vmatprep.subr.bf16.mxu1 %v3348_v0  ;;  %v3201_v0 = vpack.c.bf16 %v1506_v17, %v1505_v15  ;;  %v3209_v24 = vpack.c.bf16 %v1510_v23, %v1509_v21 }
 0xb32   :  { %3192 = vmatpush3.bf16.msra.mxu1 %v3656_v26  ;;  %v1512_v26 = vld [vmem:[#allocation2 + $0x158] sm:$0xff] }
 0xb33   :  { %v3213_v27 = vpack.c.bf16 %v1512_v26, %v1511_v25 }
 0xbe8   :  { %v1348_v6 = vpop.f32.mrb[28].mxu1 }
 0xbe9   :  { %v1352_v7 = vadd.f32 %v1348_v6, %v909_v5  ;;  %v2630_v8 = vpop.f32.mrb[29].mxu1 }
 0xbeb   :  { %3258 = vtanh.f32 %v1352_v7 }
 0xbf5   :  { %v3259_v14 = vpop.eup %3258 }
 0xbf6   :  { %2664 = vmatmul.mubr.f32.vlgmr.msra.gmra.mrb[14].mxu0 %v3259_v14 }
 0xbf7   :  { %3196 = vmatpush3.bf16.msra.mxu0 %v3193_v4  ;;  %2733 = vmatprep.mubr.f32.mxu0 %v3720_v42 }
 0xbf8   :  { %3198 = vmatprep.subr.bf16.mxu0 %v3197_v13 }
 0xbfb   :  { %3200 = vmatpush3.bf16.msra.mxu0 %v3197_v13  ;;  %v919_v13 = vadd.f32 %v3741_v43, %v3717_v38 }
 0xbfc   :  { %3202 = vmatprep.subr.bf16.mxu0 %v3201_v0 }
 0xbff   :  { %3204 = vmatpush3.bf16.msra.mxu0 %v3201_v0 }
 0xc00   :  { %3206 = vmatprep.subr.bf16.mxu0 %v3205_v20 }
 0xc03   :  { %3208 = vmatpush3.bf16.msra.mxu0 %v3205_v20 }
 0xc04   :  { %3210 = vmatprep.subr.bf16.mxu0 %v3209_v24 }
 0xc07   :  { %3212 = vmatpush3.bf16.msra.mxu0 %v3209_v24 }
 0xc08   :  { %3214 = vmatprep.subr.bf16.mxu0 %v3213_v27 }
 0xc0b   :  { %3216 = vmatpush3.bf16.msra.mxu0 %v3213_v27 }
 0xc0c   :  { %3218 = vmatprep.subr.bf16.mxu0 %v3217_v31 }
 0xc0f   :  { %3220 = vmatpush3.bf16.msra.mxu0 %v3217_v31 }
 0xc10   :  { %3222 = vmatprep.subr.bf16.mxu0 %v3221_v33 }
 0xc13   :  { %3224 = vmatpush3.bf16.msra.mxu0 %v3221_v33 }
 0xc16   :  { %2734 = vmatmul.mubr.f32.vlgmr.msra.gmra.mrb[16].mxu0 %v3747_v49 }
 0xc17   :  { %2736 = vmatprep.mubr.f32.mxu0 %v3770_v54 }
 0xc1a   :  { %2737 = vmatmul.mubr.f32.gmra.mrb[18].mxu0 %v3793_v59 }
 0xc1b   :  { %2739 = vmatprep.mubr.f32.mxu0 %v3815_v3 }
 0xc1e   :  { %2740 = vmatmul.mubr.f32.gmra.mrb[20].mxu0 %v3259_v14 }
 0xcc9   :  { %v1420_v36 = vpop.f32.mrb[14].mxu0 }
 0xcca   :  { %v1424_v16 = vadd.f32 %v1420_v36, %v914_v35  ;;  %v2665_v22 = vpop.f32.mrb[15].mxu0 }
 0xccc   :  { %3260 = vtanh.f32 %v1424_v16 }
 0xcd6   :  { %v3261_v28 = vpop.eup %3260 }
 0xcd7   :  { %2699 = vmatmul.mubr.f32.vlgmr.msra.gmra.mrb[30].mxu1 %v3261_v28  ;;  %2742 = vmatprep.mubr.f32.mxu0 %v3261_v28 }
 0xce9   :  { %v2735_v37 = vpop.f32.mrb[16].mxu0 }
 0xcea   :  { %v1597_v39 = vadd.f32 %v2735_v37, %v3847_v34  ;;  %v1591_v40 = vpop.f32.mrb[17].mxu0 }
 0xceb   :  { %v1592_v9 = vadd.f32 %v3847_v34, %v1591_v40 }
 0xcec   :  { %v1702_v41 = vmul.f32 -1.442695, %v1597_v39 }
 0xced   :  { %v1701_v42 = vmul.f32 -1.442695, %v1592_v9  ;;  %v2738_v44 = vpop.f32.mrb[18].mxu0 }
 0xcee   :  { %3262 = vpow2.f32 %v1702_v41  ;;  %v1607_v45 = vadd.f32 %v2738_v44, %v3847_v34  ;;  %v1601_v46 = vpop.f32.mrb[19].mxu0 }
 0xcef   :  { %3264 = vpow2.f32 %v1701_v42  ;;  %v1602_v47 = vadd.f32 %v3847_v34, %v1601_v46 }
 0xcf0   :  { %v1704_v48 = vmul.f32 -1.442695, %v1607_v45 }
 0xcf1   :  { %v1703_v49 = vmul.f32 -1.442695, %v1602_v47  ;;  %v2741_v50 = vpop.f32.mrb[20].mxu0 }
 0xcf2   :  { %3266 = vpow2.f32 %v1704_v48  ;;  %v1617_v51 = vadd.f32 %v2741_v50, %v3847_v34  ;;  %v1611_v52 = vpop.f32.mrb[21].mxu0 }
 0xcf3   :  { %3268 = vpow2.f32 %v1703_v49  ;;  %v1612_v53 = vadd.f32 %v3847_v34, %v1611_v52 }
 0xcf4   :  { %v1706_v54 = vmul.f32 -1.442695, %v1617_v51 }
 0xcf5   :  { %v1705_v55 = vmul.f32 -1.442695, %v1612_v53 }
 0xcf6   :  { %3270 = vpow2.f32 %v1706_v54 }
 0xcf7   :  { %3272 = vpow2.f32 %v1705_v55 }
 0xcf8   :  { %v3263_v56 = vpop.eup %3262 }
 0xcf9   :  { %v3265_v57 = vpop.eup %3264  ;;  %v1655_v58 = vadd.f32 1.0, %v3263_v56 }
 0xcfa   :  { %v1654_v59 = vadd.f32 1.0, %v3265_v57 }
 0xcfb   :  { %3274 = vrcp.f32 %v1655_v58 }
 0xcfc   :  { %v3267_v60 = vpop.eup %3266  ;;  %3276 = vrcp.f32 %v1654_v59 }
 0xcfd   :  { %v3269_v61 = vpop.eup %3268  ;;  %v1657_v62 = vadd.f32 1.0, %v3267_v60 }
 0xcfe   :  { %v1656_v2 = vadd.f32 1.0, %v3269_v61 }
 0xcff   :  { %3278 = vrcp.f32 %v1657_v62 }
 0xd00   :  { %v3271_v3 = vpop.eup %3270  ;;  %3280 = vrcp.f32 %v1656_v2 }
 0xd01   :  { %v3273_v1 = vpop.eup %3272  ;;  %v1659_v63 = vadd.f32 1.0, %v3271_v3 }
 0xd02   :  { %v1658_v4 = vadd.f32 1.0, %v3273_v1 }
 0xd03   :  { %3282 = vrcp.f32 %v1659_v63 }
 0xd04   :  { %3284 = vrcp.f32 %v1658_v4 }
 0xd05   :  { %v3275_v5 = vpop.eup %3274 }
 0xd06   :  { %v3277_v6 = vpop.eup %3276  ;;  %1679 = vst [vmem:[%s3890_s4 + $0x8] sm:$0xff] %v3275_v5 }
 0xd07   :  { %1678 = vst [vmem:[%s3890_s4] sm:$0xff] %v3277_v6 }
 0xd09   :  { %v3279_v7 = vpop.eup %3278 }
 0xd0a   :  { %v3281_v8 = vpop.eup %3280  ;;  %1681 = vst [vmem:[%s3890_s4 + $0x18] sm:$0xff] %v3279_v7 }
 0xd0b   :  { %1680 = vst [vmem:[%s3890_s4 + $0x10] sm:$0xff] %v3281_v8 }
 0xd0d   :  { %v3283_v10 = vpop.eup %3282 }
 0xd0e   :  { %v3285_v12 = vpop.eup %3284  ;;  %1683 = vst [vmem:[%s3890_s4 + $0x28] sm:$0xff] %v3283_v10 }
 0xd0f   :  { %1682 = vst [vmem:[%s3890_s4 + $0x20] sm:$0xff] %v3285_v12 }
 0xdaa   :  { %v1492_v14 = vpop.f32.mrb[30].mxu1 }
 0xdab   :  { %v1496_v15 = vadd.f32 %v1492_v14, %v919_v13  ;;  %v2700_v17 = vpop.f32.mrb[31].mxu1 }
 0xdad   :  { %3286 = vtanh.f32 %v1496_v15 }
 0xdb7   :  { %v3287_v0 = vpop.eup %3286 }
 0xdb8   :  { %1499 = vst [vmem:[%s3891_s5 + $0x8] sm:$0xff] %v3287_v0  ;;  %2743 = vmatmul.mubr.f32.gmra.mrb[22].mxu0 %v3287_v0 }
 0xe8b   :  { %v2744_v18 = vpop.f32.mrb[22].mxu0 }
 0xe8c   :  { %v1627_v19 = vadd.f32 %v2744_v18, %v3847_v34  ;;  %v1621_v20 = vpop.f32.mrb[23].mxu0 }
 0xe8d   :  { %v1622_v21 = vadd.f32 %v3847_v34, %v1621_v20 }
 0xe8e   :  { %v1708_v23 = vmul.f32 -1.442695, %v1627_v19 }
 0xe8f   :  { %v1707_v24 = vmul.f32 -1.442695, %v1622_v21 }
 0xe90   :  { %3288 = vpow2.f32 %v1708_v23 }
 0xe91   :  { %3290 = vpow2.f32 %v1707_v24 }
 0xe9a   :  { %v3289_v38 = vpop.eup %3288 }
 0xe9b   :  { %v3291_v43 = vpop.eup %3290  ;;  %v1661_v25 = vadd.f32 1.0, %v3289_v38 }
 0xe9c   :  { %v1660_v26 = vadd.f32 1.0, %v3291_v43 }
 0xe9d   :  { %3292 = vrcp.f32 %v1661_v25 }
 0xe9e   :  { %3294 = vrcp.f32 %v1660_v26 }
 0xea7   :  { %v3293_v27 = vpop.eup %3292 }
 0xea8   :  { %v3295_v29 = vpop.eup %3294  ;;  %1685 = vst [vmem:[%s3890_s4 + $0x38] sm:$0xff] %v3293_v27 }
 0xea9   :  { %1684 = vst [vmem:[%s3890_s4 + $0x30] sm:$0xff] %v3295_v29 }
 0xeaa   :  { %1694 = vsyncpa [#allocation3], 1 }
 0xeab   :  { %1695 = vsyncpa [#allocation5], 1 }

</bundles_post_ra>
